<compile_context>
chip_gen: v7x
topology: tpu7x:2x2x1
jax: 0.10.0
libtpu: 0.0.40
codegen_flags: <defaults>
</compile_context>

<pallas_src>
import jax
import jax.numpy as jnp
from jax.experimental import pallas as pl
from jax.experimental.pallas import tpu as pltpu


def _res_block_kernel(x_ref, w1_ref, s1_ref, b1_ref, w2_ref, s2_ref, b2_ref,
                      out_ref, acc_ref, y_ref):
    # x_ref  : (1, H, W*C)   f32  one image, rows x (width*channels)
    # w1_ref : (3, W*C, W*C) bf16 band matrices of conv1 (one per row tap dh)
    # s1/b1  : (1, W*C)      f32  folded BN1 scale / bias (channel-tiled over W)
    # w2_ref : (3, W*C, W*C) bf16 band matrices of conv2
    # s2/b2  : (1, W*C)      f32  folded BN2 scale / bias
    # out_ref: (1, H, W*C)   f32
    # acc_ref: (H, W*C)      f32  VMEM accumulator
    # y_ref  : (H, W*C)      bf16 VMEM conv1 activation (conv2 LHS)
    _, H, _ = x_ref.shape

    x_f32 = x_ref[0]                          # reused (exactly) for the residual
    x_bf = x_f32.astype(jnp.bfloat16)

    # ---------------- conv1 + BN1 + ReLU ----------------
    # center row tap (dh == 1): contributes to every output row
    acc_ref[...] = jnp.dot(x_bf, w1_ref[1], preferred_element_type=jnp.float32)
    # dh == 0: input row h-1 -> output rows 1..H-1 (row 0 sees the zero halo)
    acc_ref[pl.ds(1, H - 1), :] += jnp.dot(
        x_bf[:H - 1, :], w1_ref[0], preferred_element_type=jnp.float32)
    # dh == 2: input row h+1 -> output rows 0..H-2 (row H-1 sees the zero halo)
    acc_ref[pl.ds(0, H - 1), :] += jnp.dot(
        x_bf[1:, :], w1_ref[2], preferred_element_type=jnp.float32)

    y_ref[...] = jnp.maximum(
        acc_ref[...] * s1_ref[...] + b1_ref[...], 0.0).astype(jnp.bfloat16)

    # ---------------- conv2 + BN2 ----------------
    acc_ref[...] = jnp.dot(y_ref[...], w2_ref[1],
                           preferred_element_type=jnp.float32)
    acc_ref[pl.ds(1, H - 1), :] += jnp.dot(
        y_ref[pl.ds(0, H - 1), :], w2_ref[0], preferred_element_type=jnp.float32)
    acc_ref[pl.ds(0, H - 1), :] += jnp.dot(
        y_ref[pl.ds(1, H - 1), :], w2_ref[2], preferred_element_type=jnp.float32)

    # residual add (identity path) + final ReLU
    out_ref[0] = jnp.maximum(acc_ref[...] * s2_ref[...] + b2_ref[...] + x_f32,
                             0.0)


def _band_matrices(w_hwio, width):
    """Fold the 3 width taps (+ width zero padding) of a 3x3 conv into
    block-Toeplitz matrices.

    Returns B of shape (3, W*Cin, W*Cout) with
      B[dh, w_in*Cin + ci, w_out*Cout + co] = w[dh, dw, ci, co]
    where dw = w_in - w_out + 1 if 0 <= dw < 3, else 0 (implicit zero pad).
    """
    kh, kw, cin, cout = w_hwio.shape
    assert kh == 3 and kw == 3
    win = jnp.arange(width)[:, None]
    wout = jnp.arange(width)[None, :]
    sel = jnp.stack(
        [(win == wout + dw - 1).astype(w_hwio.dtype) for dw in range(3)],
        axis=0)                                         # (3, W, W)
    # r[dh, w_in, ci, w_out, co] = sum_dw sel[dw, w_in, w_out] * w[dh, dw, ci, co]
    r = jnp.einsum("dpq,hdio->hpiqo", sel, w_hwio)
    return r.reshape(3, width * cin, width * cout)


def res_block_forward(x_nchw, params, eps=1e-5):
    """x_nchw: (N, C, H, W) float32.  Returns (N, C, H, W) float32."""
    x_nchw = x_nchw.astype(jnp.float32)
    N, C, H, W = x_nchw.shape
    WC = W * C
    # NCHW -> NHWC -> (N, H, W*C): rows on sublanes, width*channels on lanes.
    x = jnp.transpose(x_nchw, (0, 2, 3, 1)).reshape(N, H, WC)

    # PyTorch conv weights are OIHW -> HWIO, then fold width taps into K.
    w1 = jnp.transpose(params["w1"], (2, 3, 1, 0)).astype(jnp.float32)
    w2 = jnp.transpose(params["w2"], (2, 3, 1, 0)).astype(jnp.float32)
    B1 = _band_matrices(w1, W).astype(jnp.bfloat16)      # (3, W*C, W*C)
    B2 = _band_matrices(w2, W).astype(jnp.bfloat16)

    # Fold eval-mode BN (+ conv bias) into per-channel scale & bias:
    #   BN(conv + b) = s*conv + (beta + s*(b - mean)),  s = gamma/sqrt(var+eps)
    s1 = params["gamma1"] / jnp.sqrt(params["var1"] + eps)
    b1 = params["beta1"] + s1 * (params["b1"] - params["mean1"])
    s2 = params["gamma2"] / jnp.sqrt(params["var2"] + eps)
    b2 = params["beta2"] + s2 * (params["b2"] - params["mean2"])
    # Broadcast the per-channel vectors to the (W*C) lane layout.
    s1l = jnp.tile(s1, W).reshape(1, WC).astype(jnp.float32)
    b1l = jnp.tile(b1, W).reshape(1, WC).astype(jnp.float32)
    s2l = jnp.tile(s2, W).reshape(1, WC).astype(jnp.float32)
    b2l = jnp.tile(b2, W).reshape(1, WC).astype(jnp.float32)

    out = pl.pallas_call(
        _res_block_kernel,
        out_shape=jax.ShapeDtypeStruct((N, H, WC), jnp.float32),
        grid=(N,),
        in_specs=[
            pl.BlockSpec((1, H, WC), lambda n: (n, 0, 0)),   # x: one image/step
            pl.BlockSpec((3, WC, WC), lambda n: (0, 0, 0)),  # B1 (grid-invariant)
            pl.BlockSpec((1, WC), lambda n: (0, 0)),         # s1
            pl.BlockSpec((1, WC), lambda n: (0, 0)),         # b1
            pl.BlockSpec((3, WC, WC), lambda n: (0, 0, 0)),  # B2
            pl.BlockSpec((1, WC), lambda n: (0, 0)),         # s2
            pl.BlockSpec((1, WC), lambda n: (0, 0)),         # b2
        ],
        out_specs=pl.BlockSpec((1, H, WC), lambda n: (n, 0, 0)),
        scratch_shapes=[
            pltpu.VMEM((H, WC), jnp.float32),    # f32 accumulator
            pltpu.VMEM((H, WC), jnp.bfloat16),   # conv1 activation
        ],
        compiler_params=pltpu.CompilerParams(
            dimension_semantics=("parallel",),     # batch axis -> both TCs (v7x)
            vmem_limit_bytes=48 * 1024 * 1024,     # raise v5e/v6e 16/32 MiB default
        ),
    )(x, B1, s1l, b1l, B2, s2l, b2l)

    # (N, H, W*C) -> (N, H, W, C) -> NCHW
    return jnp.transpose(out.reshape(N, H, W, C), (0, 3, 1, 2))


# ---------------------------- pure-JAX reference ----------------------------
def _ref_forward(x_nchw, params, eps=1e-5):
    def conv(x, w, b):
        y = jax.lax.conv_general_dilated(
            x, w, window_strides=(1, 1), padding=((1, 1), (1, 1)),
            dimension_numbers=("NCHW", "OIHW", "NCHW"))
        return y + b[None, :, None, None]

    def bn(x, g, be, m, v):
        return (x - m[None, :, None, None]) / jnp.sqrt(v + eps)[None, :, None, None] \
               * g[None, :, None, None] + be[None, :, None, None]

    h = conv(x_nchw, params["w1"], params["b1"])
    h = jnp.maximum(bn(h, params["gamma1"], params["beta1"],
                       params["mean1"], params["var1"]), 0.0)
    h = conv(h, params["w2"], params["b2"])
    h = bn(h, params["gamma2"], params["beta2"], params["mean2"], params["var2"])
    return jnp.maximum(h + x_nchw, 0.0)


if __name__ == "__main__":
    # Small shapes consistent with the module: ch_in == ch_out (downsample=None).
    N, C, H, W = 2, 16, 16, 16
    key = jax.random.PRNGKey(0)
    ks = jax.random.split(key, 10)

    params = {
        "w1":     0.1 * jax.random.normal(ks[0], (C, C, 3, 3), jnp.float32),  # OIHW
        "b1":     0.1 * jax.random.normal(ks[1], (C,), jnp.float32),
        "gamma1": 1.0 + 0.1 * jax.random.normal(ks[2], (C,), jnp.float32),
        "beta1":  0.1 * jax.random.normal(ks[3], (C,), jnp.float32),
        "mean1":  0.1 * jax.random.normal(ks[4], (C,), jnp.float32),
        "var1":   jnp.ones((C,), jnp.float32),
        "w2":     0.1 * jax.random.normal(ks[5], (C, C, 3, 3), jnp.float32),  # OIHW
        "b2":     0.1 * jax.random.normal(ks[6], (C,), jnp.float32),
        "gamma2": 1.0 + 0.1 * jax.random.normal(ks[7], (C,), jnp.float32),
        "beta2":  0.1 * jax.random.normal(ks[8], (C,), jnp.float32),
        "mean2":  jnp.zeros((C,), jnp.float32),
        "var2":   jnp.ones((C,), jnp.float32),
    }

    x = jax.random.normal(ks[9], (N, C, H, W), jnp.float32)

    out = res_block_forward(x, params)
    out = jax.block_until_ready(out)

    ref = _ref_forward(x, params)
    assert out.shape == (N, C, H, W)
    max_err = jnp.max(jnp.abs(out - ref))
    # bf16 MXU operands with f32 accumulation -> loose-but-meaningful tolerance.
    assert jnp.allclose(out, ref, atol=5e-2, rtol=5e-2), \
        f"max abs err {max_err}"

    print("KERNEL_OK")
</pallas_src>

<mosaic_0001>
module attributes {stable_mosaic.version = 11 : i64} {
  func.func @_res_block_kernel(%arg0: i32, %arg1: memref<1x16x256xf32, #tpu.memory_space<vmem>>, %arg2: memref<3x256x256xbf16, #tpu.memory_space<vmem>>, %arg3: memref<1x256xf32, #tpu.memory_space<vmem>>, %arg4: memref<1x256xf32, #tpu.memory_space<vmem>>, %arg5: memref<3x256x256xbf16, #tpu.memory_space<vmem>>, %arg6: memref<1x256xf32, #tpu.memory_space<vmem>>, %arg7: memref<1x256xf32, #tpu.memory_space<vmem>>, %arg8: memref<1x16x256xf32, #tpu.memory_space<vmem>>, %arg9: memref<16x256xf32, #tpu.memory_space<vmem>>, %arg10: memref<16x256xbf16, #tpu.memory_space<vmem>>) attributes {dimension_semantics = [#tpu.dimension_semantics<parallel>], iteration_bounds = array<i64: 2>, scalar_prefetch = 0 : i64, scratch_operands = 2 : i64, tpu.core_type = #tpu.core_type<tc>, window_params = [{transform_indices = @transform_0, window_bounds = array<i64: 1, 16, 256>}, {pipeline_mode = #tpu.pipeline_mode<synchronous>, transform_indices = @transform_1, window_bounds = array<i64: 3, 256, 256>}, {pipeline_mode = #tpu.pipeline_mode<synchronous>, transform_indices = @transform_2, window_bounds = array<i64: 1, 256>}, {pipeline_mode = #tpu.pipeline_mode<synchronous>, transform_indices = @transform_3, window_bounds = array<i64: 1, 256>}, {pipeline_mode = #tpu.pipeline_mode<synchronous>, transform_indices = @transform_4, window_bounds = array<i64: 3, 256, 256>}, {pipeline_mode = #tpu.pipeline_mode<synchronous>, transform_indices = @transform_5, window_bounds = array<i64: 1, 256>}, {pipeline_mode = #tpu.pipeline_mode<synchronous>, transform_indices = @transform_6, window_bounds = array<i64: 1, 256>}, {transform_indices = @transform_7, window_bounds = array<i64: 1, 16, 256>}]} {
    %c0 = arith.constant 0 : index
    %c0_0 = arith.constant 0 : index
    %c0_1 = arith.constant 0 : index
    %0 = vector.load %arg1[%c0, %c0_0, %c0_1] : memref<1x16x256xf32, #tpu.memory_space<vmem>>, vector<1x16x256xf32>
    %1 = vector.shape_cast %0 : vector<1x16x256xf32> to vector<16x256xf32>
    %2 = arith.truncf %1 : vector<16x256xf32> to vector<16x256xbf16>
    %c1 = arith.constant 1 : index
    %c0_2 = arith.constant 0 : index
    %c0_3 = arith.constant 0 : index
    %3 = vector.load %arg2[%c1, %c0_2, %c0_3] : memref<3x256x256xbf16, #tpu.memory_space<vmem>>, vector<1x256x256xbf16>
    %4 = vector.shape_cast %3 : vector<1x256x256xbf16> to vector<256x256xbf16>
    %cst = arith.constant dense<0.000000e+00> : vector<16x256xf32>
    %5 = tpu.matmul %2, %4, %cst {dimension_numbers = #tpu.dot_dimension_numbers<[1], [0], [0], [1], [0, 0, 1, 1], [], []>} : vector<16x256xbf16>, vector<256x256xbf16>, vector<16x256xf32> -> vector<16x256xf32>
    %c0_4 = arith.constant 0 : index
    %c0_5 = arith.constant 0 : index
    %6 = vector.load %arg9[%c0_4, %c0_5] : memref<16x256xf32, #tpu.memory_space<vmem>>, vector<16x256xf32>
    tpu.vector_store %arg9[%c0_4, %c0_5], %5 {strides = array<i32>} : memref<16x256xf32, #tpu.memory_space<vmem>>, vector<16x256xf32>,
    %c1_6 = arith.constant 1 : index
    %c0_7 = arith.constant 0 : index
    %7 = vector.load %arg9[%c1_6, %c0_7] : memref<16x256xf32, #tpu.memory_space<vmem>>, vector<15x256xf32>
    %8 = vector.extract_strided_slice %2 {offsets = [0, 0], sizes = [15, 256], strides = [1, 1]} : vector<16x256xbf16> to vector<15x256xbf16>
    %c0_8 = arith.constant 0 : index
    %c0_9 = arith.constant 0 : index
    %c0_10 = arith.constant 0 : index
    %9 = vector.load %arg2[%c0_8, %c0_9, %c0_10] : memref<3x256x256xbf16, #tpu.memory_space<vmem>>, vector<1x256x256xbf16>
    %10 = vector.shape_cast %9 : vector<1x256x256xbf16> to vector<256x256xbf16>
    %cst_11 = arith.constant dense<0.000000e+00> : vector<15x256xf32>
    %11 = tpu.matmul %8, %10, %cst_11 {dimension_numbers = #tpu.dot_dimension_numbers<[1], [0], [0], [1], [0, 0, 1, 1], [], []>} : vector<15x256xbf16>, vector<256x256xbf16>, vector<15x256xf32> -> vector<15x256xf32>
    %12 = arith.addf %7, %11 : vector<15x256xf32>
    %c1_12 = arith.constant 1 : index
    %c0_13 = arith.constant 0 : index
    %13 = vector.load %arg9[%c1_12, %c0_13] : memref<16x256xf32, #tpu.memory_space<vmem>>, vector<15x256xf32>
    tpu.vector_store %arg9[%c1_12, %c0_13], %12 {strides = array<i32>} : memref<16x256xf32, #tpu.memory_space<vmem>>, vector<15x256xf32>,
    %c0_14 = arith.constant 0 : index
    %c0_15 = arith.constant 0 : index
    %14 = vector.load %arg9[%c0_14, %c0_15] : memref<16x256xf32, #tpu.memory_space<vmem>>, vector<15x256xf32>
    %15 = vector.extract_strided_slice %2 {offsets = [1, 0], sizes = [15, 256], strides = [1, 1]} : vector<16x256xbf16> to vector<15x256xbf16>
    %c2 = arith.constant 2 : index
    %c0_16 = arith.constant 0 : index
    %c0_17 = arith.constant 0 : index
    %16 = vector.load %arg2[%c2, %c0_16, %c0_17] : memref<3x256x256xbf16, #tpu.memory_space<vmem>>, vector<1x256x256xbf16>
    %17 = vector.shape_cast %16 : vector<1x256x256xbf16> to vector<256x256xbf16>
    %cst_18 = arith.constant dense<0.000000e+00> : vector<15x256xf32>
    %18 = tpu.matmul %15, %17, %cst_18 {dimension_numbers = #tpu.dot_dimension_numbers<[1], [0], [0], [1], [0, 0, 1, 1], [], []>} : vector<15x256xbf16>, vector<256x256xbf16>, vector<15x256xf32> -> vector<15x256xf32>
    %19 = arith.addf %14, %18 : vector<15x256xf32>
    %c0_19 = arith.constant 0 : index
    %c0_20 = arith.constant 0 : index
    %20 = vector.load %arg9[%c0_19, %c0_20] : memref<16x256xf32, #tpu.memory_space<vmem>>, vector<15x256xf32>
    tpu.vector_store %arg9[%c0_19, %c0_20], %19 {strides = array<i32>} : memref<16x256xf32, #tpu.memory_space<vmem>>, vector<15x256xf32>,
    %c0_21 = arith.constant 0 : index
    %c0_22 = arith.constant 0 : index
    %21 = vector.load %arg9[%c0_21, %c0_22] : memref<16x256xf32, #tpu.memory_space<vmem>>, vector<16x256xf32>
    %c0_23 = arith.constant 0 : index
    %c0_24 = arith.constant 0 : index
    %22 = vector.load %arg3[%c0_23, %c0_24] : memref<1x256xf32, #tpu.memory_space<vmem>>, vector<1x256xf32>
    %23 = vector.broadcast %22 : vector<1x256xf32> to vector<16x256xf32>
    %24 = arith.mulf %21, %23 : vector<16x256xf32>
    %c0_25 = arith.constant 0 : index
    %c0_26 = arith.constant 0 : index
    %25 = vector.load %arg4[%c0_25, %c0_26] : memref<1x256xf32, #tpu.memory_space<vmem>>, vector<1x256xf32>
    %26 = vector.broadcast %25 : vector<1x256xf32> to vector<16x256xf32>
    %27 = arith.addf %24, %26 : vector<16x256xf32>
    %cst_27 = arith.constant 0.000000e+00 : f32
    %28 = vector.broadcast %cst_27 : f32 to vector<16x256xf32>
    %29 = arith.maximumf %27, %28 : vector<16x256xf32>
    %30 = arith.truncf %29 : vector<16x256xf32> to vector<16x256xbf16>
    %c0_28 = arith.constant 0 : index
    %c0_29 = arith.constant 0 : index
    %31 = vector.load %arg10[%c0_28, %c0_29] : memref<16x256xbf16, #tpu.memory_space<vmem>>, vector<16x256xbf16>
    tpu.vector_store %arg10[%c0_28, %c0_29], %30 {strides = array<i32>} : memref<16x256xbf16, #tpu.memory_space<vmem>>, vector<16x256xbf16>,
    %c0_30 = arith.constant 0 : index
    %c0_31 = arith.constant 0 : index
    %32 = vector.load %arg10[%c0_30, %c0_31] : memref<16x256xbf16, #tpu.memory_space<vmem>>, vector<16x256xbf16>
    %c1_32 = arith.constant 1 : index
    %c0_33 = arith.constant 0 : index
    %c0_34 = arith.constant 0 : index
    %33 = vector.load %arg5[%c1_32, %c0_33, %c0_34] : memref<3x256x256xbf16, #tpu.memory_space<vmem>>, vector<1x256x256xbf16>
    %34 = vector.shape_cast %33 : vector<1x256x256xbf16> to vector<256x256xbf16>
    %cst_35 = arith.constant dense<0.000000e+00> : vector<16x256xf32>
    %35 = tpu.matmul %32, %34, %cst_35 {dimension_numbers = #tpu.dot_dimension_numbers<[1], [0], [0], [1], [0, 0, 1, 1], [], []>} : vector<16x256xbf16>, vector<256x256xbf16>, vector<16x256xf32> -> vector<16x256xf32>
    %c0_36 = arith.constant 0 : index
    %c0_37 = arith.constant 0 : index
    %36 = vector.load %arg9[%c0_36, %c0_37] : memref<16x256xf32, #tpu.memory_space<vmem>>, vector<16x256xf32>
    tpu.vector_store %arg9[%c0_36, %c0_37], %35 {strides = array<i32>} : memref<16x256xf32, #tpu.memory_space<vmem>>, vector<16x256xf32>,
    %c1_38 = arith.constant 1 : index
    %c0_39 = arith.constant 0 : index
    %37 = vector.load %arg9[%c1_38, %c0_39] : memref<16x256xf32, #tpu.memory_space<vmem>>, vector<15x256xf32>
    %c0_40 = arith.constant 0 : index
    %c0_41 = arith.constant 0 : index
    %38 = vector.load %arg10[%c0_40, %c0_41] : memref<16x256xbf16, #tpu.memory_space<vmem>>, vector<15x256xbf16>
    %c0_42 = arith.constant 0 : index
    %c0_43 = arith.constant 0 : index
    %c0_44 = arith.constant 0 : index
    %39 = vector.load %arg5[%c0_42, %c0_43, %c0_44] : memref<3x256x256xbf16, #tpu.memory_space<vmem>>, vector<1x256x256xbf16>
    %40 = vector.shape_cast %39 : vector<1x256x256xbf16> to vector<256x256xbf16>
    %cst_45 = arith.constant dense<0.000000e+00> : vector<15x256xf32>
    %41 = tpu.matmul %38, %40, %cst_45 {dimension_numbers = #tpu.dot_dimension_numbers<[1], [0], [0], [1], [0, 0, 1, 1], [], []>} : vector<15x256xbf16>, vector<256x256xbf16>, vector<15x256xf32> -> vector<15x256xf32>
    %42 = arith.addf %37, %41 : vector<15x256xf32>
    %c1_46 = arith.constant 1 : index
    %c0_47 = arith.constant 0 : index
    %43 = vector.load %arg9[%c1_46, %c0_47] : memref<16x256xf32, #tpu.memory_space<vmem>>, vector<15x256xf32>
    tpu.vector_store %arg9[%c1_46, %c0_47], %42 {strides = array<i32>} : memref<16x256xf32, #tpu.memory_space<vmem>>, vector<15x256xf32>,
    %c0_48 = arith.constant 0 : index
    %c0_49 = arith.constant 0 : index
    %44 = vector.load %arg9[%c0_48, %c0_49] : memref<16x256xf32, #tpu.memory_space<vmem>>, vector<15x256xf32>
    %c1_50 = arith.constant 1 : index
    %c0_51 = arith.constant 0 : index
    %45 = vector.load %arg10[%c1_50, %c0_51] : memref<16x256xbf16, #tpu.memory_space<vmem>>, vector<15x256xbf16>
    %c2_52 = arith.constant 2 : index
    %c0_53 = arith.constant 0 : index
    %c0_54 = arith.constant 0 : index
    %46 = vector.load %arg5[%c2_52, %c0_53, %c0_54] : memref<3x256x256xbf16, #tpu.memory_space<vmem>>, vector<1x256x256xbf16>
    %47 = vector.shape_cast %46 : vector<1x256x256xbf16> to vector<256x256xbf16>
    %cst_55 = arith.constant dense<0.000000e+00> : vector<15x256xf32>
    %48 = tpu.matmul %45, %47, %cst_55 {dimension_numbers = #tpu.dot_dimension_numbers<[1], [0], [0], [1], [0, 0, 1, 1], [], []>} : vector<15x256xbf16>, vector<256x256xbf16>, vector<15x256xf32> -> vector<15x256xf32>
    %49 = arith.addf %44, %48 : vector<15x256xf32>
    %c0_56 = arith.constant 0 : index
    %c0_57 = arith.constant 0 : index
    %50 = vector.load %arg9[%c0_56, %c0_57] : memref<16x256xf32, #tpu.memory_space<vmem>>, vector<15x256xf32>
    tpu.vector_store %arg9[%c0_56, %c0_57], %49 {strides = array<i32>} : memref<16x256xf32, #tpu.memory_space<vmem>>, vector<15x256xf32>,
    %c0_58 = arith.constant 0 : index
    %c0_59 = arith.constant 0 : index
    %51 = vector.load %arg9[%c0_58, %c0_59] : memref<16x256xf32, #tpu.memory_space<vmem>>, vector<16x256xf32>
    %c0_60 = arith.constant 0 : index
    %c0_61 = arith.constant 0 : index
    %52 = vector.load %arg6[%c0_60, %c0_61] : memref<1x256xf32, #tpu.memory_space<vmem>>, vector<1x256xf32>
    %53 = vector.broadcast %52 : vector<1x256xf32> to vector<16x256xf32>
    %54 = arith.mulf %51, %53 : vector<16x256xf32>
    %c0_62 = arith.constant 0 : index
    %c0_63 = arith.constant 0 : index
    %55 = vector.load %arg7[%c0_62, %c0_63] : memref<1x256xf32, #tpu.memory_space<vmem>>, vector<1x256xf32>
    %56 = vector.broadcast %55 : vector<1x256xf32> to vector<16x256xf32>
    %57 = arith.addf %54, %56 : vector<16x256xf32>
    %58 = arith.addf %57, %1 : vector<16x256xf32>
    %cst_64 = arith.constant 0.000000e+00 : f32
    %59 = vector.broadcast %cst_64 : f32 to vector<16x256xf32>
    %60 = arith.maximumf %58, %59 : vector<16x256xf32>
    %c0_65 = arith.constant 0 : index
    %c0_66 = arith.constant 0 : index
    %c0_67 = arith.constant 0 : index
    %61 = vector.load %arg8[%c0_65, %c0_66, %c0_67] : memref<1x16x256xf32, #tpu.memory_space<vmem>>, vector<1x16x256xf32>
    %62 = vector.shape_cast %61 : vector<1x16x256xf32> to vector<16x256xf32>
    %63 = vector.shape_cast %60 : vector<16x256xf32> to vector<1x16x256xf32>
    tpu.vector_store %arg8[%c0_65, %c0_66, %c0_67], %63 {strides = array<i32>} : memref<1x16x256xf32, #tpu.memory_space<vmem>>, vector<1x16x256xf32>,
    return
  }
  func.func @transform_0(%arg0: i32) -> (i32, i32, i32) {
    %c0_i32 = arith.constant 0 : i32
    %c0_i32_0 = arith.constant 0 : i32
    %c0_i32_1 = arith.constant 0 : i32
    return %arg0, %c0_i32, %c0_i32_0 : i32, i32, i32
  }
  func.func @transform_1(%arg0: i32) -> (i32, i32, i32) {
    %c0_i32 = arith.constant 0 : i32
    %c0_i32_0 = arith.constant 0 : i32
    %c0_i32_1 = arith.constant 0 : i32
    %c0_i32_2 = arith.constant 0 : i32
    return %c0_i32, %c0_i32_0, %c0_i32_1 : i32, i32, i32
  }
  func.func @transform_2(%arg0: i32) -> (i32, i32) {
    %c0_i32 = arith.constant 0 : i32
    %c0_i32_0 = arith.constant 0 : i32
    %c0_i32_1 = arith.constant 0 : i32
    return %c0_i32, %c0_i32_0 : i32, i32
  }
  func.func @transform_3(%arg0: i32) -> (i32, i32) {
    %c0_i32 = arith.constant 0 : i32
    %c0_i32_0 = arith.constant 0 : i32
    %c0_i32_1 = arith.constant 0 : i32
    return %c0_i32, %c0_i32_0 : i32, i32
  }
  func.func @transform_4(%arg0: i32) -> (i32, i32, i32) {
    %c0_i32 = arith.constant 0 : i32
    %c0_i32_0 = arith.constant 0 : i32
    %c0_i32_1 = arith.constant 0 : i32
    %c0_i32_2 = arith.constant 0 : i32
    return %c0_i32, %c0_i32_0, %c0_i32_1 : i32, i32, i32
  }
  func.func @transform_5(%arg0: i32) -> (i32, i32) {
    %c0_i32 = arith.constant 0 : i32
    %c0_i32_0 = arith.constant 0 : i32
    %c0_i32_1 = arith.constant 0 : i32
    return %c0_i32, %c0_i32_0 : i32, i32
  }
  func.func @transform_6(%arg0: i32) -> (i32, i32) {
    %c0_i32 = arith.constant 0 : i32
    %c0_i32_0 = arith.constant 0 : i32
    %c0_i32_1 = arith.constant 0 : i32
    return %c0_i32, %c0_i32_0 : i32, i32
  }
  func.func @transform_7(%arg0: i32) -> (i32, i32, i32) {
    %c0_i32 = arith.constant 0 : i32
    %c0_i32_0 = arith.constant 0 : i32
    %c0_i32_1 = arith.constant 0 : i32
    return %arg0, %c0_i32, %c0_i32_0 : i32, i32, i32
  }
}

</mosaic_0001>

<bundles_post_ra>
// kernel: tpu_custom_call.1
= control target key start
LH: loop header
LB: loop body
LE: loop exit
PB: predicated region body
PF: predicated region fallthrough
CT: control target
= control target key end

     0   :  { %12 = vsyncpa [#allocation5], 0  ;;  %s3140_s0 = inlined_call_operand.hbm [shape: f32[2,16,256], index: 0, kind: input, shape index: {}]   ;;  %s3141_s1 = inlined_call_operand.hbm [shape: bf16[3,256,256], index: 1, kind: input, shape index: {}]   ;;  %s3142_s2 = inlined_call_operand.vmem [shape: f32[1,256], index: 2, kind: input, shape index: {}]   ;;  %s3143_s3 = inlined_call_operand.vmem [shape: f32[1,256], index: 3, kind: input, shape index: {}]   ;;  %s3144_s4 = inlined_call_operand.hbm [shape: bf16[3,256,256], index: 4, kind: input, shape index: {}]   ;;  %s3145_s5 = inlined_call_operand.vmem [shape: f32[1,256], index: 5, kind: input, shape index: {}]   ;;  %s3146_s6 = inlined_call_operand.vmem [shape: f32[1,256], index: 6, kind: input, shape index: {}]   ;;  %s3147_s7 = inlined_call_operand.hbm [shape: f32[2,16,256], index: 7, kind: output, shape index: {}]  }
   0x1   :  { %14 = vsyncpa [#allocation5 + $0x1], 0 }
   0x2   :  { %15 = vsyncpa [#allocation8], 0 }
   0x3   :  { %16 = vsyncpa [#allocation6], 0 }
   0x4   :  { %18 = vsyncpa [#allocation6 + $0x1], 0  ;;  %s2852_s24 = smov 0   ;;  %s2854_s25 = smov 0  }
   0x5   :  { %s2856_s26 = smov 0   ;;  %s2858_s27 = smov 0  }
   0x6 LB: > { %s2873_s28 = sadd.s32 4294967295, %s2800_s27   ;;  %s2067_s29 = sadd.s32 4294967294, %s2800_s27   ;;  %s2800_s27 = sphi %s2858_s27, %s3167_s27   ;;  %s2796_s26 = sphi %s2856_s26, %s3166_s26   ;;  %s2792_s25 = sphi %s2854_s25, %s3165_s25   ;;  %s2788_s24 = sphi %s2852_s24, %s3164_s24  }
   0x7   : > { %p44_p0 = scmp.ne.s32.totalorder %s2792_s25, %s2788_s24  ;;  %p3148_p1 = scmp.eq.s32.totalorder %s2873_s28, 0 }
   0x8   : > { %p200_p3 = scmp.eq.s32.totalorder %s2067_s29, 1  ;;  %p2068_p5 = scmp.ge.s32.totalorder %s2800_s27, 1 }
   0x9   : > { %p2882_p4 = por %p3148_p1, %p44_p0  ;;  %p207_p7 = scmp.lt.s32.totalorder %s2800_s27, 3 }
   0xa   : > { %p2887_p6 = por %p200_p3, %p44_p0  ;;  %s2802_s10 = smov [#allocation7]  }
   0xb   : > { %s3151_s30 = scalar_select %p2882_p4, 1, 0 }
   0xc   : > { %s3152_s8 = scalar_select %p2887_p6, 1, 0 }
   0xd   : > { %p2892_p8 = pnand %p2068_p5, %p207_p7  ;;  %s219_s11 = sshll.u32 %s2802_s10, 4  ;;  %s2896_s11 = int_to_ptr.vmem [resolvable:$true] %s219_s11 }
   0xe   : > { %s2803_s13 = smov [#allocation9]   ;;  %s2644_s17 = scalar_lea.hbm %s3141_s1, 12288 }
   0xf   : > { %p2291_p9 = pneg %p2892_p8  ;;  %s238_s14 = sshll.u32 %s2803_s13, 4  ;;  %s2907_s14 = int_to_ptr.vmem [resolvable:$true] %s238_s14 }
  0x10   : > { %p2645_p12 = scmp.ne.s32.totalorder %s3141_s1, %s2644_s17  ;;  %p2651_p5 = scmp.lt.u32.totalorder %s2644_s17, %s3141_s1 }
  0x11   : > { %p2903_p11 = pnand %p2291_p9, %p3148_p1 }
  0x13   : > { %p2646_p13 = pneg %p2903_p11 }
  0x15   : > { %p2647_p0 = pnand %p2646_p13, %p2645_p12 }
  0x17   : > { %p2648_p3 = pneg %p2647_p0 }
  0x19   : > { %p2653_p7 = pnand %p2651_p5, %p2648_p3 }
  0x1b   : > { %2656 = shalt.err (!%p2653_p7)
}
  0x1c   : > { %s2657_s22 = scalar_lea.vmem %s2896_s11, 12288  ;;  %p2665_p2 = scmp.lt.s32.totalorder %s2896_s11, %s2896_s11 }
  0x1d   : > { %p2658_p9 = scmp.ne.s32.totalorder %s2896_s11, %s2657_s22  ;;  %p2666_p12 = scmp.lt.s32.totalorder %s2657_s22, %s2657_s22 }
  0x1f   : > { %p2660_p10 = pnand %p2658_p9, %p2646_p13  ;;  %p2667_p0 = por %p2666_p12, %p2665_p2 }
  0x21   : > { %p2661_p1 = pneg %p2660_p10 }
  0x23   : > { %p2668_p6 = pnand %p2667_p0, %p2661_p1 }
  0x25   : > { %2671 = shalt.err (!%p2668_p6)
}
  0x26   : > { %s2804_s23 = smov 128   ;;  %s2805_s29 = smov 8  }
  0x27   : > { %2294 = dma.hbm_to_vmem [thread:$0]  (!%p2903_p11), %s3141_s1, 12288, %s2896_s11, [#allocation8], %s2804_s23, %s2804_s23, %s2805_s29  }
  0x28   : > { %s2672_s17 = scalar_lea.hbm %s3144_s4, 12288 }
  0x29   : > { %p2673_p2 = scmp.ne.s32.totalorder %s3144_s4, %s2672_s17  ;;  %p2679_p10 = scmp.lt.u32.totalorder %s2672_s17, %s3144_s4 }
  0x2b   : > { %p2675_p1 = pnand %p2673_p2, %p2646_p13 }
  0x2d   : > { %p2676_p6 = pneg %p2675_p1 }
  0x2f   : > { %p2681_p3 = pnand %p2679_p10, %p2676_p6 }
  0x31   : > { %2684 = shalt.err (!%p2681_p3)
}
  0x32   : > { %s2685_s11 = scalar_lea.vmem %s2907_s14, 12288  ;;  %p2693_p12 = scmp.lt.s32.totalorder %s2907_s14, %s2907_s14 }
  0x33   : > { %p2686_p5 = scmp.ne.s32.totalorder %s2907_s14, %s2685_s11  ;;  %p2694_p0 = scmp.lt.s32.totalorder %s2685_s11, %s2685_s11 }
  0x35   : > { %p2688_p7 = pnand %p2686_p5, %p2646_p13  ;;  %p2695_p2 = por %p2694_p0, %p2693_p12 }
  0x37   : > { %p2689_p9 = pneg %p2688_p7 }
  0x39   : > { %p2696_p1 = pnand %p2695_p2, %p2689_p9 }
  0x3b   : > { %2699 = shalt.err (!%p2696_p1)
}
  0x3c   : > { %2297 = dma.hbm_to_vmem [thread:$0]  (!%p2903_p11), %s3144_s4, 12288, %s2907_s14, [#allocation8], %s2804_s23, %s2804_s23, %s2805_s29  }
  0x3d   : > { %s2962_s13 = sadd.s32 1, %s2800_s27   ;;  %s31_s12 = sadd.s32 1, %s2796_s26 }
  0x3e   : > { %s28_s15 = ssub.s32 %s2800_s27, %s2962_s13  ;;  %p38_p13 = scmp.ne.s32.totalorder %s2796_s26, %s2792_s25 }
  0x3f   : > { %p29_p6 = scmp.eq.s32.totalorder %s28_s15, 0  ;;  %p39_p10 = scmp.eq.s32.totalorder %s2800_s27, 0 }
  0x40   : > { %p3155_p3 = scmp.eq.s32.totalorder %s2873_s28, 1  ;;  %p2308_p7 = scmp.lt.s32.totalorder %s2800_s27, 2 }
  0x41   : > { %s2978_s17 = scalar_select %p29_p6, %s2796_s26, %s31_s12  }
  0x42   : > { %p2972_p5 = por %p3155_p3, %p38_p13  ;;  %p40_p9 = por %p39_p10, %p38_p13 }
  0x43   : > { %s258_s18 = sand.u32 1, %s2796_s26   ;;  %s2277_s14 = sshll.u32 %s2800_s27, 9 }
  0x44   : > { %s3156_s16 = scalar_select %p2972_p5, 1, 0 }
  0x45   : > { %s2072_s19 = sshll.u32 %s258_s18, 5  ;;  %s2985_s20 = scalar_lea.hbm %s3140_s0, %s2277_s14 }
  0x46   : > { %s262_s21 = scalar_lea.vmem [#allocation4], %s2072_s19  ;;  %p2989_p11 = pnand %p2308_p7, %p40_p9 }
  0x47   : > { %s269_s11 = sshll.u32 %s262_s21, 4  ;;  %s2993_s10 = scalar_lea.sflag [#allocation5], %s258_s18  ;;  %s2987_s11 = int_to_ptr.vmem [resolvable:$true] %s269_s11 }
  0x48   : > { %s2700_s12 = scalar_lea.hbm %s2985_s20, 512  ;;  %p2702_p0 = pneg %p2989_p11 }
  0x49   : > { %p2701_p12 = scmp.ne.s32.totalorder %s2985_s20, %s2700_s12  ;;  %s2705_s14 = scalar_lea.hbm %s3140_s0, 1024 }
  0x4a   : > { %p2706_p13 = scmp.lt.u32.totalorder %s2985_s20, %s3140_s0  ;;  %p2707_p6 = scmp.lt.u32.totalorder %s2705_s14, %s2700_s12 }
  0x4b   : > { %p2703_p2 = pnand %p2702_p0, %p2701_p12  ;;  %p2709_p3 = scmp.lt.u32.totalorder %s2700_s12, %s2985_s20 }
  0x4c   : > { %p2708_p10 = por %p2707_p6, %p2706_p13 }
  0x4d   : > { %p2704_p1 = pneg %p2703_p2 }
  0x4e   : > { %p2710_p7 = por %p2709_p3, %p2708_p10 }
  0x50   : > { %p2711_p9 = pnand %p2710_p7, %p2704_p1 }
  0x52   : > { %2714 = shalt.err (!%p2711_p9)
}
  0x53   : > { %s2715_s18 = scalar_lea.vmem %s2987_s11, 512  ;;  %s2806_s21 = smov [#allocation4]  }
  0x54   : > { %p2716_p12 = scmp.ne.s32.totalorder %s2987_s11, %s2715_s18  ;;  %s2720_s15 = sshll.u32 %s2806_s21, 4  ;;  %s2721_s15 = int_to_ptr.vmem [resolvable:$false] %s2720_s15 }
  0x55   : > { %s2722_s19 = scalar_lea.vmem %s2721_s15, 1024  ;;  %p2723_p4 = scmp.lt.s32.totalorder %s2987_s11, %s2721_s15 }
  0x56   : > { %p2718_p2 = pnand %p2716_p12, %p2702_p0  ;;  %p2724_p13 = scmp.lt.s32.totalorder %s2722_s19, %s2715_s18 }
  0x58   : > { %p2719_p5 = pneg %p2718_p2  ;;  %p2725_p6 = por %p2724_p13, %p2723_p4 }
  0x5a   : > { %p2726_p10 = pnand %p2725_p6, %p2719_p5 }
  0x5c   : > { %2729 = shalt.err (!%p2726_p10)
}
  0x5d   : > { %s2807_s12 = smov 256   ;;  %s2808_s14 = smov 16  }
  0x5e   : > { %2301 = dma.hbm_to_vmem [thread:$0]  (!%p2989_p11), %s2985_s20, 512, %s2987_s11, %s2993_s10, %s2807_s12, %s2807_s12, %s2808_s14  }
  0x5f   : > { %281 = sbr.rel (%p2892_p8) target bundleno = 781 (0x30d), region = 48  ;;  %s3024_s23 = sand.u32 (!%p2892_p8), 1, %s2792_s25  }
  0x60   : > { %s2076_s29 = sshll.u32 (!%p2892_p8), %s3024_s23, 5  ;;  %s284_s18 = scalar_lea.sflag (!%p2892_p8), [#allocation5], %s3024_s23 }
  0x61   : > { %s3030_s21 = scalar_lea.vmem (!%p2892_p8), [#allocation4], %s2076_s29  ;;  %p3158_p4 = scmp.ne.s32.totalorder (!%p2892_p8), %s3151_s30, 0 }
  0x66   : > { %2775 = dma.done.wait (%p3158_p4), %s284_s18, 512  }
  0x67   : > { %2777 = vsyncadd (%p3158_p4), %s284_s18, 4294966784  ;;  %p3159_p5 = scmp.eq.s32.totalorder %s2873_s28, 0 }
  0x69   : > { %2779 = dma.done.wait (%p3159_p5), [#allocation8], 24576   ;;  %p3160_p8 = pmov %p3159_p5 }
  0x6a   : > { %v2352_v0 = vld [vmem:[#allocation7 + $0x104] ss:$8 sps:$4 sm:$0xff]   ;;  %v2354_v1 = vld [vmem:[#allocation7 + $0x100] ss:$8 sps:$4 sm:$0xff]   ;;  %v2355_v2 = vld [vmem:[#allocation7 + $0x114] ss:$8 sps:$4 sm:$0xff]  }
  0x6b   : > { %2781 = vsyncadd (%p3160_p8), [#allocation8], 4294942720  ;;  %525 = vmatprep.subr.bf16.mxu0 %v2352_v0  ;;  %v2357_v3 = vld [vmem:[#allocation7 + $0x110] ss:$8 sps:$4 sm:$0xff]   ;;  %v2358_v4 = vld [vmem:[#allocation7 + $0x4] ss:$8 sps:$4 sm:$0xff]  }
  0x6c   : > { %526 = vmatpush1.bf16.msra.mxu0 %v2354_v1  ;;  %v2360_v5 = vld [vmem:[#allocation7] ss:$8 sps:$4 sm:$0xff]   ;;  %v2361_v6 = vld [vmem:[#allocation7 + $0x124] ss:$8 sps:$4 sm:$0xff]   ;;  %768 = vmatprep.subr.bf16.mxu1 %v2358_v4  ;;  %v2364_v7 = vld [vmem:[#allocation7 + $0x14] ss:$8 sps:$4 sm:$0xff]  }
  0x6d   : > { %527 = vmatprep.subr.bf16.mxu0 %v2355_v2  ;;  %769 = vmatpush1.bf16.msra.mxu1 %v2360_v5  ;;  %v2366_v8 = vld [vmem:[#allocation7 + $0x10] ss:$8 sps:$4 sm:$0xff]   ;;  %v2363_v9 = vld [vmem:[#allocation7 + $0x120] ss:$8 sps:$4 sm:$0xff]   ;;  %v2367_v10 = vld [vmem:[#allocation7 + $0x134] ss:$8 sps:$4 sm:$0xff]  }
  0x6e   : > { %770 = vmatprep.subr.bf16.mxu1 %v2364_v7  ;;  %v2370_v11 = vld [vmem:[#allocation7 + $0x24] ss:$8 sps:$4 sm:$0xff]   ;;  %v2372_v12 = vld [vmem:[#allocation7 + $0x20] ss:$8 sps:$4 sm:$0xff]   ;;  %v2369_v13 = vld [vmem:[#allocation7 + $0x130] ss:$8 sps:$4 sm:$0xff]  }
  0x6f   : > { %v2376_v14 = vld [vmem:[#allocation7 + $0x34] ss:$8 sps:$4 sm:$0xff]   ;;  %v2373_v15 = vld [vmem:[#allocation7 + $0x144] ss:$8 sps:$4 sm:$0xff]   ;;  %v2378_v16 = vld [vmem:[#allocation7 + $0x30] ss:$8 sps:$4 sm:$0xff]  }
  0x70   : > { %528 = vmatpush1.bf16.msra.mxu0 %v2357_v3  ;;  %v2375_v17 = vld [vmem:[#allocation7 + $0x140] ss:$8 sps:$4 sm:$0xff]   ;;  %v2382_v18 = vld [vmem:[#allocation7 + $0x44] ss:$8 sps:$4 sm:$0xff]   ;;  %v2379_v19 = vld [vmem:[#allocation7 + $0x154] ss:$8 sps:$4 sm:$0xff]  }
  0x71   : > { %529 = vmatprep.subr.bf16.mxu0 %v2361_v6  ;;  %771 = vmatpush1.bf16.msra.mxu1 %v2366_v8  ;;  %v2384_v20 = vld [vmem:[#allocation7 + $0x40] ss:$8 sps:$4 sm:$0xff]   ;;  %v2381_v21 = vld [vmem:[#allocation7 + $0x150] ss:$8 sps:$4 sm:$0xff]   ;;  %v2388_v22 = vld [vmem:[#allocation7 + $0x54] ss:$8 sps:$4 sm:$0xff]  }
  0x72   : > { %772 = vmatprep.subr.bf16.mxu1 %v2370_v11  ;;  %v2385_v23 = vld [vmem:[#allocation7 + $0x164] ss:$8 sps:$4 sm:$0xff]   ;;  %v2390_v24 = vld [vmem:[#allocation7 + $0x50] ss:$8 sps:$4 sm:$0xff]   ;;  %v2387_v25 = vld [vmem:[#allocation7 + $0x160] ss:$8 sps:$4 sm:$0xff]  }
  0x73   : > { %v2394_v26 = vld [vmem:[#allocation7 + $0x64] ss:$8 sps:$4 sm:$0xff]   ;;  %v2391_v27 = vld [vmem:[#allocation7 + $0x174] ss:$8 sps:$4 sm:$0xff]   ;;  %v2396_v28 = vld [vmem:[#allocation7 + $0x60] ss:$8 sps:$4 sm:$0xff]  }
  0x74   : > { %530 = vmatpush1.bf16.msra.mxu0 %v2363_v9  ;;  %v2393_v29 = vld [vmem:[#allocation7 + $0x170] ss:$8 sps:$4 sm:$0xff]   ;;  %v2400_v30 = vld [vmem:[#allocation7 + $0x74] ss:$8 sps:$4 sm:$0xff]   ;;  %v2397_v31 = vld [vmem:[#allocation7 + $0x184] ss:$8 sps:$4 sm:$0xff]  }
  0x75   : > { %531 = vmatprep.subr.bf16.mxu0 %v2367_v10  ;;  %773 = vmatpush1.bf16.msra.mxu1 %v2372_v12  ;;  %v2402_v32 = vld [vmem:[#allocation7 + $0x70] ss:$8 sps:$4 sm:$0xff]   ;;  %v2399_v33 = vld [vmem:[#allocation7 + $0x180] ss:$8 sps:$4 sm:$0xff]   ;;  %v2406_v34 = vld [vmem:[#allocation7 + $0x84] ss:$8 sps:$4 sm:$0xff]  }
  0x76   : > { %774 = vmatprep.subr.bf16.mxu1 %v2376_v14  ;;  %v2403_v35 = vld [vmem:[#allocation7 + $0x194] ss:$8 sps:$4 sm:$0xff]   ;;  %v2408_v36 = vld [vmem:[#allocation7 + $0x80] ss:$8 sps:$4 sm:$0xff]   ;;  %v2405_v37 = vld [vmem:[#allocation7 + $0x190] ss:$8 sps:$4 sm:$0xff]  }
  0x77   : > { %v2412_v38 = vld [vmem:[#allocation7 + $0x94] ss:$8 sps:$4 sm:$0xff]   ;;  %v2409_v39 = vld [vmem:[#allocation7 + $0x1a4] ss:$8 sps:$4 sm:$0xff]   ;;  %v2414_v40 = vld [vmem:[#allocation7 + $0x90] ss:$8 sps:$4 sm:$0xff]  }
  0x78   : > { %532 = vmatpush1.bf16.msra.mxu0 %v2369_v13  ;;  %v2411_v41 = vld [vmem:[#allocation7 + $0x1a0] ss:$8 sps:$4 sm:$0xff]   ;;  %v2418_v42 = vld [vmem:[#allocation7 + $0xa4] ss:$8 sps:$4 sm:$0xff]   ;;  %v2415_v43 = vld [vmem:[#allocation7 + $0x1b4] ss:$8 sps:$4 sm:$0xff]  }
  0x79   : > { %533 = vmatprep.subr.bf16.mxu0 %v2373_v15  ;;  %775 = vmatpush1.bf16.msra.mxu1 %v2378_v16  ;;  %v327_v44 = vld [vmem:[%s3030_s21 + $0x8] sm:$0xff]  ;;  %v329_v45 = vld [vmem:[%s3030_s21 + $0x18] sm:$0xff]  ;;  %v326_v2 = vld [vmem:[%s3030_s21] sm:$0xff]  ;;  %vm815_vm0 = vcmask 1040384   ;;  %s325_s12 = scalar_lea.vmem [#allocation10], %s2076_s29  ;;  %s2278_s14 = sshll.u32 %s2873_s28, 9 }
  0x7a   : > { %776 = vmatprep.subr.bf16.mxu1 %v2382_v18  ;;  %v2420_v46 = vld [vmem:[#allocation7 + $0xa0] ss:$8 sps:$4 sm:$0xff]   ;;  %v331_v47 = vpack.c.bf16 %v329_v45, %v327_v44  ;;  %v2417_v48 = vld [vmem:[#allocation7 + $0x1b0] ss:$8 sps:$4 sm:$0xff]   ;;  %v2424_v49 = vld [vmem:[#allocation7 + $0xb4] ss:$8 sps:$4 sm:$0xff]   ;;  %s3094_s29 = scalar_lea.hbm %s3147_s7, %s2278_s14 }
  0x7b   : > { %v2421_v50 = vld [vmem:[#allocation7 + $0x1c4] ss:$8 sps:$4 sm:$0xff]   ;;  %v2426_v51 = vld [vmem:[#allocation7 + $0xb0] ss:$8 sps:$4 sm:$0xff]   ;;  %v2423_v52 = vld [vmem:[#allocation7 + $0x1c0] ss:$8 sps:$4 sm:$0xff]  }
  0x7c   : > { %534 = vmatpush1.bf16.msra.mxu0 %v2375_v17  ;;  %557 = vmatprep.mubr.bf16.mxu0 %v331_v47  ;;  %v2430_v53 = vld [vmem:[#allocation7 + $0xc4] ss:$8 sps:$4 sm:$0xff]   ;;  %v2427_v54 = vld [vmem:[#allocation7 + $0x1d4] ss:$8 sps:$4 sm:$0xff]   ;;  %v2432_v55 = vld [vmem:[#allocation7 + $0xc0] ss:$8 sps:$4 sm:$0xff]  }
  0x7d   : > { %535 = vmatprep.subr.bf16.mxu0 %v2379_v19  ;;  %777 = vmatpush1.bf16.msra.mxu1 %v2384_v20  ;;  %v2429_v56 = vld [vmem:[#allocation7 + $0x1d0] ss:$8 sps:$4 sm:$0xff]   ;;  %v2436_v57 = vld [vmem:[#allocation7 + $0xd4] ss:$8 sps:$4 sm:$0xff]   ;;  %v2433_v58 = vld [vmem:[#allocation7 + $0x1e4] ss:$8 sps:$4 sm:$0xff]  }
  0x7e   : > { %778 = vmatprep.subr.bf16.mxu1 %v2388_v22  ;;  %800 = vmatprep.mubr.bf16.mxu1 %v331_v47  ;;  %v2438_v59 = vld [vmem:[#allocation7 + $0xd0] ss:$8 sps:$4 sm:$0xff]   ;;  %v2435_v60 = vld [vmem:[#allocation7 + $0x1e0] ss:$8 sps:$4 sm:$0xff]   ;;  %v2442_v61 = vld [vmem:[#allocation7 + $0xe4] ss:$8 sps:$4 sm:$0xff]  }
  0x7f   : > { %v881_v62 = vshll.u32 %v331_v47, 16  ;;  %v2439_v63 = vld [vmem:[#allocation7 + $0x1f4] ss:$8 sps:$4 sm:$0xff]   ;;  %v2441_v0 = vld [vmem:[#allocation7 + $0x1f0] ss:$8 sps:$4 sm:$0xff]   ;;  %v879_v5 = vshrl.u32 %v331_v47, 16 }
  0x80   : > { %536 = vmatpush1.bf16.msra.mxu0 %v2381_v21  ;;  %v2444_v1 = vld [vmem:[#allocation7 + $0xe0] ss:$8 sps:$4 sm:$0xff]   ;;  %v328_v3 = vld [vmem:[%s3030_s21 + $0x10] sm:$0xff]  ;;  %v2447_v7 = vld [vmem:[#allocation7 + $0x204] ss:$8 sps:$4 sm:$0xff]   ;;  %s1975_s18 = sshll.u32 %s325_s12, 4  ;;  %s3096_s18 = int_to_ptr.vmem [resolvable:$true] %s1975_s18 }
  0x81   : > { %537 = vmatprep.subr.bf16.mxu0 %v2385_v23  ;;  %779 = vmatpush1.bf16.msra.mxu1 %v2390_v24  ;;  %v2448_v4 = vld [vmem:[#allocation7 + $0xf4] ss:$8 sps:$4 sm:$0xff]   ;;  %v883_v6 = vrot.slane %v881_v62, 1  ;;  %v3044_v8 = vpack.c.bf16 %v328_v3, %v326_v2  ;;  %v2450_v9 = vld [vmem:[#allocation7 + $0xf0] ss:$8 sps:$4 sm:$0xff]   ;;  %s1962_s28 = scalar_lea.sflag [#allocation6], %s3024_s23 }
  0x82   : > { %780 = vmatprep.subr.bf16.mxu1 %v2394_v26  ;;  %v2445_v10 = vld [vmem:[#allocation7 + $0x200] ss:$8 sps:$4 sm:$0xff]   ;;  %v2453_v12 = vld [vmem:[#allocation7 + $0x214] ss:$8 sps:$4 sm:$0xff]   ;;  %v2451_v13 = vld [vmem:[#allocation7 + $0x210] ss:$8 sps:$4 sm:$0xff]  }
  0x83   : > { %v884_v11 = vor.u32 %v883_v6, %v879_v5  ;;  %v2456_v14 = vld [vmem:[#allocation7 + $0x224] ss:$8 sps:$4 sm:$0xff]   ;;  %v2454_v15 = vld [vmem:[#allocation7 + $0x220] ss:$8 sps:$4 sm:$0xff]   ;;  %v2459_v16 = vld [vmem:[#allocation7 + $0x234] ss:$8 sps:$4 sm:$0xff]  }
  0x84   : > { %538 = vmatpush1.bf16.msra.mxu0 %v2387_v25  ;;  %v2457_v17 = vld [vmem:[#allocation7 + $0x230] ss:$8 sps:$4 sm:$0xff]   ;;  %v2462_v18 = vld [vmem:[#allocation7 + $0x244] ss:$8 sps:$4 sm:$0xff]   ;;  %v2460_v19 = vld [vmem:[#allocation7 + $0x240] ss:$8 sps:$4 sm:$0xff]  }
  0x85   : > { %539 = vmatprep.subr.bf16.mxu0 %v2391_v27  ;;  %781 = vmatpush1.bf16.msra.mxu1 %v2396_v28  ;;  %v2465_v20 = vld [vmem:[#allocation7 + $0x254] ss:$8 sps:$4 sm:$0xff]   ;;  %v2463_v21 = vld [vmem:[#allocation7 + $0x250] ss:$8 sps:$4 sm:$0xff]   ;;  %v2468_v22 = vld [vmem:[#allocation7 + $0x264] ss:$8 sps:$4 sm:$0xff]  }
  0x86   : > { %782 = vmatprep.subr.bf16.mxu1 %v2400_v30  ;;  %v2466_v23 = vld [vmem:[#allocation7 + $0x260] ss:$8 sps:$4 sm:$0xff]   ;;  %v2471_v24 = vld [vmem:[#allocation7 + $0x274] ss:$8 sps:$4 sm:$0xff]   ;;  %v2469_v25 = vld [vmem:[#allocation7 + $0x270] ss:$8 sps:$4 sm:$0xff]  }
  0x87   : > { %v2474_v26 = vld [vmem:[#allocation7 + $0x284] ss:$8 sps:$4 sm:$0xff]   ;;  %v2472_v27 = vld [vmem:[#allocation7 + $0x280] ss:$8 sps:$4 sm:$0xff]   ;;  %v2477_v28 = vld [vmem:[#allocation7 + $0x294] ss:$8 sps:$4 sm:$0xff]  }
  0x88   : > { %540 = vmatpush1.bf16.msra.mxu0 %v2393_v29  ;;  %v2475_v29 = vld [vmem:[#allocation7 + $0x290] ss:$8 sps:$4 sm:$0xff]   ;;  %v2480_v30 = vld [vmem:[#allocation7 + $0x2a4] ss:$8 sps:$4 sm:$0xff]   ;;  %v2528_v2 = vld [vmem:[#allocation9 + $0x154] ss:$8 sps:$4 sm:$0xff]  }
  0x89   : > { %541 = vmatprep.subr.bf16.mxu0 %v2397_v31  ;;  %783 = vmatpush1.bf16.msra.mxu1 %v2402_v32  ;;  %v2478_v31 = vld [vmem:[#allocation7 + $0x2a0] ss:$8 sps:$4 sm:$0xff]   ;;  %v2483_v32 = vld [vmem:[#allocation7 + $0x2b4] ss:$8 sps:$4 sm:$0xff]   ;;  %v2493_v44 = vld [vmem:[#allocation7 + $0x2f0] ss:$8 sps:$4 sm:$0xff]  }
  0x8a   : > { %784 = vmatprep.subr.bf16.mxu1 %v2406_v34  ;;  %v2486_v34 = vld [vmem:[#allocation7 + $0x2c4] ss:$8 sps:$4 sm:$0xff]   ;;  %v2531_v3 = vld [vmem:[#allocation9 + $0x54] ss:$8 sps:$4 sm:$0xff]   ;;  %v2529_v5 = vld [vmem:[#allocation9 + $0x50] ss:$8 sps:$4 sm:$0xff]  }
  0x8b   : > { %v2498_v47 = vld [vmem:[#allocation9 + $0x104] ss:$8 sps:$4 sm:$0xff]   ;;  %s2730_s20 = scalar_lea.vmem %s3096_s18, 512  ;;  %p3161_p0 = scmp.ne.s32.totalorder %s3156_s16, 0 }
  0x8c   : > { %542 = vmatpush1.bf16.msra.mxu0 %v2399_v33  ;;  %v2481_v33 = vld [vmem:[#allocation7 + $0x2b0] ss:$8 sps:$4 sm:$0xff]   ;;  %v2522_v62 = vld [vmem:[#allocation9 + $0x144] ss:$8 sps:$4 sm:$0xff]   ;;  %p2731_p11 = scmp.ne.s32.totalorder %s3096_s18, %s2730_s20 }
  0x8d   : > { %543 = vmatprep.subr.bf16.mxu0 %v2403_v35  ;;  %785 = vmatpush1.bf16.msra.mxu1 %v2408_v36  ;;  %v2484_v35 = vld [vmem:[#allocation7 + $0x2c0] ss:$8 sps:$4 sm:$0xff]   ;;  %v2489_v36 = vld [vmem:[#allocation7 + $0x2d4] ss:$8 sps:$4 sm:$0xff]   ;;  %v2534_v6 = vld [vmem:[#allocation9 + $0x164] ss:$8 sps:$4 sm:$0xff]  }
  0x8e   : > { %786 = vmatprep.subr.bf16.mxu1 %v2412_v38  ;;  %v2492_v38 = vld [vmem:[#allocation7 + $0x2e4] ss:$8 sps:$4 sm:$0xff]   ;;  %p2732_p1 = pnand %p2731_p11, %p3161_p0 }
  0x90   : > { %544 = vmatpush1.bf16.msra.mxu0 %v2405_v37  ;;  %v2487_v37 = vld [vmem:[#allocation7 + $0x2d0] ss:$8 sps:$4 sm:$0xff]   ;;  %p2733_p3 = pneg %p2732_p1 }
  0x91   : > { %545 = vmatprep.subr.bf16.mxu0 %v2409_v39  ;;  %787 = vmatpush1.bf16.msra.mxu1 %v2414_v40  ;;  %v874_v39 = vshll.u32 %v3044_v8, 16  ;;  %v2490_v40 = vld [vmem:[#allocation7 + $0x2e0] ss:$8 sps:$4 sm:$0xff]  }
  0x92   : > { %788 = vmatprep.subr.bf16.mxu1 %v2418_v42  ;;  %v872_v42 = vshrl.u32 %v3044_v8, 16 }
  0x94   : > { %546 = vmatpush1.bf16.msra.mxu0 %v2411_v41  ;;  %v2495_v41 = vld [vmem:[#allocation7 + $0x2f4] ss:$8 sps:$4 sm:$0xff]  }
  0x95   : > { %547 = vmatprep.subr.bf16.mxu0 %v2415_v43  ;;  %789 = vmatpush1.bf16.msra.mxu1 %v2420_v46  ;;  %v876_v43 = vrot.slane %v874_v39, 1  ;;  %v2496_v46 = vld [vmem:[#allocation9 + $0x100] ss:$8 sps:$4 sm:$0xff]   ;;  %v2585_v39 = vld [vmem:[#allocation9 + $0xe4] ss:$8 sps:$4 sm:$0xff]  }
  0x96   : > { %790 = vmatprep.subr.bf16.mxu1 %v2424_v49  ;;  %v2501_v49 = vld [vmem:[#allocation9 + $0x4] ss:$8 sps:$4 sm:$0xff]  }
  0x97   : > { %v877_v45 = vor.u32 %v876_v43, %v872_v42  ;;  %v2588_v42 = vld [vmem:[#allocation9 + $0x1f4] ss:$8 sps:$4 sm:$0xff]  }
  0x98   : > { %548 = vmatpush1.bf16.msra.mxu0 %v2417_v48  ;;  %v2499_v48 = vld [vmem:[#allocation9] ss:$8 sps:$4 sm:$0xff]   ;;  %v2591_v43 = vld [vmem:[#allocation9 + $0xf4] ss:$8 sps:$4 sm:$0xff]  }
  0x99   : > { %549 = vmatprep.subr.bf16.mxu0 %v2421_v50  ;;  %791 = vmatpush1.bf16.msra.mxu1 %v2426_v51  ;;  %v2504_v50 = vld [vmem:[#allocation9 + $0x114] ss:$8 sps:$4 sm:$0xff]  }
  0x9a   : > { %792 = vmatprep.subr.bf16.mxu1 %v2430_v53  ;;  %v2507_v51 = vld [vmem:[#allocation9 + $0x14] ss:$8 sps:$4 sm:$0xff]   ;;  %v2505_v53 = vld [vmem:[#allocation9 + $0x10] ss:$8 sps:$4 sm:$0xff]  }
  0x9c   : > { %550 = vmatpush1.bf16.msra.mxu0 %v2423_v52  ;;  %v2502_v52 = vld [vmem:[#allocation9 + $0x110] ss:$8 sps:$4 sm:$0xff]  }
  0x9d   : > { %551 = vmatprep.subr.bf16.mxu0 %v2427_v54  ;;  %793 = vmatpush1.bf16.msra.mxu1 %v2432_v55  ;;  %v2510_v54 = vld [vmem:[#allocation9 + $0x124] ss:$8 sps:$4 sm:$0xff]  }
  0x9e   : > { %794 = vmatprep.subr.bf16.mxu1 %v2436_v57  ;;  %v2513_v55 = vld [vmem:[#allocation9 + $0x24] ss:$8 sps:$4 sm:$0xff]   ;;  %v2511_v57 = vld [vmem:[#allocation9 + $0x20] ss:$8 sps:$4 sm:$0xff]  }
  0xa0   : > { %552 = vmatpush1.bf16.msra.mxu0 %v2429_v56  ;;  %v2508_v56 = vld [vmem:[#allocation9 + $0x120] ss:$8 sps:$4 sm:$0xff]  }
  0xa1   : > { %553 = vmatprep.subr.bf16.mxu0 %v2433_v58  ;;  %795 = vmatpush1.bf16.msra.mxu1 %v2438_v59  ;;  %v2516_v58 = vld [vmem:[#allocation9 + $0x134] ss:$8 sps:$4 sm:$0xff]  }
  0xa2   : > { %796 = vmatprep.subr.bf16.mxu1 %v2442_v61  ;;  %v2519_v59 = vld [vmem:[#allocation9 + $0x34] ss:$8 sps:$4 sm:$0xff]   ;;  %v2517_v61 = vld [vmem:[#allocation9 + $0x30] ss:$8 sps:$4 sm:$0xff]  }
  0xa4   : > { %554 = vmatpush1.bf16.msra.mxu0 %v2435_v60  ;;  %v2514_v60 = vld [vmem:[#allocation9 + $0x130] ss:$8 sps:$4 sm:$0xff]  }
  0xa5   : > { %555 = vmatprep.subr.bf16.mxu0 %v2439_v63  ;;  %797 = vmatpush1.bf16.msra.mxu1 %v2444_v1  ;;  %v2525_v63 = vld [vmem:[#allocation9 + $0x44] ss:$8 sps:$4 sm:$0xff]   ;;  %v2523_v1 = vld [vmem:[#allocation9 + $0x40] ss:$8 sps:$4 sm:$0xff]  }
  0xa6   : > { %798 = vmatprep.subr.bf16.mxu1 %v2448_v4  ;;  %v2526_v4 = vld [vmem:[#allocation9 + $0x150] ss:$8 sps:$4 sm:$0xff]  }
  0xa8   : > { %556 = vmatpush1.bf16.msra.mxu0 %v2441_v0  ;;  %v2520_v0 = vld [vmem:[#allocation9 + $0x140] ss:$8 sps:$4 sm:$0xff]  }
  0xa9   : > { %1047 = vmatprep.subr.bf16.mxu0 %v2447_v7  ;;  %799 = vmatpush1.bf16.msra.mxu1 %v2450_v9  ;;  %v2537_v7 = vld [vmem:[#allocation9 + $0x64] ss:$8 sps:$4 sm:$0xff]   ;;  %v2535_v9 = vld [vmem:[#allocation9 + $0x60] ss:$8 sps:$4 sm:$0xff]  }
  0xaa   : > { %1337 = vmatprep.subr.bf16.mxu1 %v2498_v47 }
  0xab   : > { %558 = vmatmul.mubr.bf16.vlgmr.msra.gmra.mrb[0].mxu0 %v3044_v8 }
  0xac   : > { %1048 = vmatpush1.bf16.msra.mxu0 %v2445_v10  ;;  %1079 = vmatprep.mubr.bf16.mxu0 %v884_v11  ;;  %v2540_v10 = vld [vmem:[#allocation9 + $0x174] ss:$8 sps:$4 sm:$0xff]  }
  0xad   : > { %1049 = vmatprep.subr.bf16.mxu0 %v2453_v12  ;;  %801 = vmatmul.mubr.bf16.vlgmr.msra.gmra.mrb[0].mxu1 %v3044_v8  ;;  %v2532_v8 = vld [vmem:[#allocation9 + $0x160] ss:$8 sps:$4 sm:$0xff]   ;;  %v2543_v11 = vld [vmem:[#allocation9 + $0x74] ss:$8 sps:$4 sm:$0xff]   ;;  %v2538_v12 = vld [vmem:[#allocation9 + $0x170] ss:$8 sps:$4 sm:$0xff]  }
  0xae   : > { %1338 = vmatpush1.bf16.msra.mxu1 %v2496_v46  ;;  %v2594_v46 = vld [vmem:[#allocation9 + $0x204] ss:$8 sps:$4 sm:$0xff]  }
  0xaf   : > { %1339 = vmatprep.subr.bf16.mxu1 %v2504_v50 }
  0xb0   : > { %1050 = vmatpush1.bf16.msra.mxu0 %v2451_v13  ;;  %v2541_v13 = vld [vmem:[#allocation9 + $0x70] ss:$8 sps:$4 sm:$0xff]  }
  0xb1   : > { %1051 = vmatprep.subr.bf16.mxu0 %v2456_v14  ;;  %v2546_v14 = vld [vmem:[#allocation9 + $0x184] ss:$8 sps:$4 sm:$0xff]  }
  0xb2   : > { %1340 = vmatpush1.bf16.msra.mxu1 %v2502_v52 }
  0xb3   : > { %1341 = vmatprep.subr.bf16.mxu1 %v2510_v54 }
  0xb4   : > { %1052 = vmatpush1.bf16.msra.mxu0 %v2454_v15  ;;  %v2549_v15 = vld [vmem:[#allocation9 + $0x84] ss:$8 sps:$4 sm:$0xff]  }
  0xb5   : > { %1053 = vmatprep.subr.bf16.mxu0 %v2459_v16  ;;  %v2544_v16 = vld [vmem:[#allocation9 + $0x180] ss:$8 sps:$4 sm:$0xff]  }
  0xb6   : > { %1342 = vmatpush1.bf16.msra.mxu1 %v2508_v56 }
  0xb7   : > { %1343 = vmatprep.subr.bf16.mxu1 %v2516_v58 }
  0xb8   : > { %1054 = vmatpush1.bf16.msra.mxu0 %v2457_v17  ;;  %v2547_v17 = vld [vmem:[#allocation9 + $0x80] ss:$8 sps:$4 sm:$0xff]  }
  0xb9   : > { %1055 = vmatprep.subr.bf16.mxu0 %v2462_v18  ;;  %v2552_v18 = vld [vmem:[#allocation9 + $0x194] ss:$8 sps:$4 sm:$0xff]  }
  0xba   : > { %1344 = vmatpush1.bf16.msra.mxu1 %v2514_v60 }
  0xbb   : > { %1345 = vmatprep.subr.bf16.mxu1 %v2522_v62 }
  0xbc   : > { %1056 = vmatpush1.bf16.msra.mxu0 %v2460_v19  ;;  %v2555_v19 = vld [vmem:[#allocation9 + $0x94] ss:$8 sps:$4 sm:$0xff]  }
  0xbd   : > { %1057 = vmatprep.subr.bf16.mxu0 %v2465_v20  ;;  %v2550_v20 = vld [vmem:[#allocation9 + $0x190] ss:$8 sps:$4 sm:$0xff]  }
  0xbe   : > { %1346 = vmatpush1.bf16.msra.mxu1 %v2520_v0 }
  0xbf   : > { %1347 = vmatprep.subr.bf16.mxu1 %v2528_v2 }
  0xc0   : > { %1058 = vmatpush1.bf16.msra.mxu0 %v2463_v21  ;;  %v2553_v21 = vld [vmem:[#allocation9 + $0x90] ss:$8 sps:$4 sm:$0xff]  }
  0xc1   : > { %1059 = vmatprep.subr.bf16.mxu0 %v2468_v22  ;;  %v2558_v22 = vld [vmem:[#allocation9 + $0x1a4] ss:$8 sps:$4 sm:$0xff]  }
  0xc2   : > { %1348 = vmatpush1.bf16.msra.mxu1 %v2526_v4 }
  0xc3   : > { %1349 = vmatprep.subr.bf16.mxu1 %v2534_v6 }
  0xc4   : > { %1060 = vmatpush1.bf16.msra.mxu0 %v2466_v23  ;;  %v2561_v23 = vld [vmem:[#allocation9 + $0xa4] ss:$8 sps:$4 sm:$0xff]  }
  0xc5   : > { %1061 = vmatprep.subr.bf16.mxu0 %v2471_v24  ;;  %v2556_v24 = vld [vmem:[#allocation9 + $0x1a0] ss:$8 sps:$4 sm:$0xff]  }
  0xc6   : > { %1350 = vmatpush1.bf16.msra.mxu1 %v2532_v8 }
  0xc7   : > { %1351 = vmatprep.subr.bf16.mxu1 %v2540_v10 }
  0xc8   : > { %1062 = vmatpush1.bf16.msra.mxu0 %v2469_v25  ;;  %v2559_v25 = vld [vmem:[#allocation9 + $0xa0] ss:$8 sps:$4 sm:$0xff]  }
  0xc9   : > { %1063 = vmatprep.subr.bf16.mxu0 %v2474_v26  ;;  %v2564_v26 = vld [vmem:[#allocation9 + $0x1b4] ss:$8 sps:$4 sm:$0xff]  }
  0xca   : > { %1352 = vmatpush1.bf16.msra.mxu1 %v2538_v12 }
  0xcb   : > { %1353 = vmatprep.subr.bf16.mxu1 %v2546_v14 }
  0xcc   : > { %1064 = vmatpush1.bf16.msra.mxu0 %v2472_v27  ;;  %v2562_v27 = vld [vmem:[#allocation9 + $0x1b0] ss:$8 sps:$4 sm:$0xff]  }
  0xcd   : > { %1065 = vmatprep.subr.bf16.mxu0 %v2477_v28  ;;  %v2567_v28 = vld [vmem:[#allocation9 + $0xb4] ss:$8 sps:$4 sm:$0xff]  }
  0xce   : > { %1354 = vmatpush1.bf16.msra.mxu1 %v2544_v16 }
  0xcf   : > { %1355 = vmatprep.subr.bf16.mxu1 %v2552_v18 }
  0xd0   : > { %1066 = vmatpush1.bf16.msra.mxu0 %v2475_v29  ;;  %v2565_v29 = vld [vmem:[#allocation9 + $0xb0] ss:$8 sps:$4 sm:$0xff]  }
  0xd1   : > { %1067 = vmatprep.subr.bf16.mxu0 %v2480_v30  ;;  %v2568_v30 = vld [vmem:[#allocation9 + $0x1c0] ss:$8 sps:$4 sm:$0xff]  }
  0xd2   : > { %1356 = vmatpush1.bf16.msra.mxu1 %v2550_v20 }
  0xd3   : > { %1357 = vmatprep.subr.bf16.mxu1 %v2558_v22 }
  0xd4   : > { %1068 = vmatpush1.bf16.msra.mxu0 %v2478_v31  ;;  %v2570_v31 = vld [vmem:[#allocation9 + $0x1c4] ss:$8 sps:$4 sm:$0xff]  }
  0xd5   : > { %1069 = vmatprep.subr.bf16.mxu0 %v2483_v32  ;;  %v2571_v32 = vld [vmem:[#allocation9 + $0xc0] ss:$8 sps:$4 sm:$0xff]  }
  0xd6   : > { %1358 = vmatpush1.bf16.msra.mxu1 %v2556_v24 }
  0xd7   : > { %1359 = vmatprep.subr.bf16.mxu1 %v2564_v26 }
  0xd8   : > { %1070 = vmatpush1.bf16.msra.mxu0 %v2481_v33  ;;  %v2573_v33 = vld [vmem:[#allocation9 + $0xc4] ss:$8 sps:$4 sm:$0xff]  }
  0xd9   : > { %1071 = vmatprep.subr.bf16.mxu0 %v2486_v34  ;;  %v2576_v34 = vld [vmem:[#allocation9 + $0x1d4] ss:$8 sps:$4 sm:$0xff]  }
  0xda   : > { %1360 = vmatpush1.bf16.msra.mxu1 %v2562_v27 }
  0xdb   : > { %1361 = vmatprep.subr.bf16.mxu1 %v2570_v31 }
  0xdc   : > { %1072 = vmatpush1.bf16.msra.mxu0 %v2484_v35  ;;  %v2579_v35 = vld [vmem:[#allocation9 + $0xd4] ss:$8 sps:$4 sm:$0xff]  }
  0xdd   : > { %1073 = vmatprep.subr.bf16.mxu0 %v2489_v36  ;;  %v2574_v36 = vld [vmem:[#allocation9 + $0x1d0] ss:$8 sps:$4 sm:$0xff]  }
  0xde   : > { %1362 = vmatpush1.bf16.msra.mxu1 %v2568_v30 }
  0xdf   : > { %1363 = vmatprep.subr.bf16.mxu1 %v2576_v34 }
  0xe0   : > { %1074 = vmatpush1.bf16.msra.mxu0 %v2487_v37  ;;  %v2577_v37 = vld [vmem:[#allocation9 + $0xd0] ss:$8 sps:$4 sm:$0xff]  }
  0xe1   : > { %1075 = vmatprep.subr.bf16.mxu0 %v2492_v38  ;;  %v2582_v38 = vld [vmem:[#allocation9 + $0x1e4] ss:$8 sps:$4 sm:$0xff]  }
  0xe2   : > { %1364 = vmatpush1.bf16.msra.mxu1 %v2574_v36 }
  0xe3   : > { %1365 = vmatprep.subr.bf16.mxu1 %v2582_v38 }
  0xe4   : > { %1076 = vmatpush1.bf16.msra.mxu0 %v2490_v40  ;;  %v2580_v40 = vld [vmem:[#allocation9 + $0x1e0] ss:$8 sps:$4 sm:$0xff]  }
  0xe5   : > { %1077 = vmatprep.subr.bf16.mxu0 %v2495_v41  ;;  %v2583_v41 = vld [vmem:[#allocation9 + $0xe0] ss:$8 sps:$4 sm:$0xff]  }
  0xe6   : > { %1366 = vmatpush1.bf16.msra.mxu1 %v2580_v40  ;;  %v2592_v40 = vld [vmem:[#allocation9 + $0x200] ss:$8 sps:$4 sm:$0xff]  }
  0xe7   : > { %1367 = vmatprep.subr.bf16.mxu1 %v2588_v42  ;;  %v2597_v42 = vld [vmem:[#allocation9 + $0x214] ss:$8 sps:$4 sm:$0xff]  }
  0xe8   : > { %1078 = vmatpush1.bf16.msra.mxu0 %v2493_v44  ;;  %v2586_v44 = vld [vmem:[#allocation9 + $0x1f0] ss:$8 sps:$4 sm:$0xff]  }
  0xe9   : > { %1582 = vmatprep.subr.bf16.mxu0 %v2501_v49 }
  0xea   : > { %1368 = vmatpush1.bf16.msra.mxu1 %v2586_v44  ;;  %v2595_v44 = vld [vmem:[#allocation9 + $0x210] ss:$8 sps:$4 sm:$0xff]  }
  0xeb   : > { %1080 = vmatmul.mubr.bf16.vlgmr.msra.gmra.mrb[4].mxu0 %v877_v45  ;;  %v2589_v45 = vld [vmem:[#allocation9 + $0xf0] ss:$8 sps:$4 sm:$0xff]   ;;  %1862 = vmatprep.subr.bf16.mxu1 %v2594_v46 }
  0xec   : > { %1583 = vmatpush1.bf16.msra.mxu0 %v2499_v48 }
  0xed   : > { %1584 = vmatprep.subr.bf16.mxu0 %v2507_v51 }
  0xf0   : > { %1585 = vmatpush1.bf16.msra.mxu0 %v2505_v53 }
  0xf1   : > { %1586 = vmatprep.subr.bf16.mxu0 %v2513_v55 }
  0xf4   : > { %1587 = vmatpush1.bf16.msra.mxu0 %v2511_v57 }
  0xf5   : > { %1588 = vmatprep.subr.bf16.mxu0 %v2519_v59 }
  0xf8   : > { %1589 = vmatpush1.bf16.msra.mxu0 %v2517_v61 }
  0xf9   : > { %1590 = vmatprep.subr.bf16.mxu0 %v2525_v63 }
  0xfc   : > { %1591 = vmatpush1.bf16.msra.mxu0 %v2523_v1 }
  0xfd   : > { %1592 = vmatprep.subr.bf16.mxu0 %v2531_v3  ;;  %v1104_v3 = vlaneseq }
  0xff   : > { %v1105_v4 = vshrl.u32 %v1104_v3, 7  ;;  %v2625_v3 = vld [vmem:[#allocation9 + $0x2b0] ss:$8 sps:$4 sm:$0xff]  }
 0x100   : > { %1593 = vmatpush1.bf16.msra.mxu0 %v2529_v5 }
 0x101   : > { %1594 = vmatprep.subr.bf16.mxu0 %v2537_v7  ;;  %v3057_v14 = vsub.s32 0, %v1105_v4 }
 0x104   : > { %1595 = vmatpush1.bf16.msra.mxu0 %v2535_v9  ;;  %v3052_v9 = vsub.s32 1, %v1105_v4  ;;  %v2630_v4 = vld [vmem:[#allocation9 + $0x2c4] ss:$8 sps:$4 sm:$0xff]  }
 0x105   : > { %1596 = vmatprep.subr.bf16.mxu0 %v2543_v11 }
 0x108   : > { %1597 = vmatpush1.bf16.msra.mxu0 %v2541_v13  ;;  %v1102_v13 = vld [vmem:[%s3142_s2] sm:$0x3] }
 0x109   : > { %1598 = vmatprep.subr.bf16.mxu0 %v2549_v15  ;;  %v1107_v22 = vrot.slane %v1102_v13, %v3057_v14 }
 0x10c   : > { %1599 = vmatpush1.bf16.msra.mxu0 %v2547_v17 }
 0x10d   : > { %1600 = vmatprep.subr.bf16.mxu0 %v2555_v19  ;;  %v1111_v19 = vrot.slane %v1102_v13, %v3052_v9  ;;  %v2637_v13 = vld [vmem:[#allocation9 + $0x2f0] ss:$8 sps:$4 sm:$0xff]  }
 0x110   : > { %1601 = vmatpush1.bf16.msra.mxu0 %v2553_v21  ;;  %v1118_v21 = vld [vmem:[%s3143_s3] sm:$0x3] }
 0x111   : > { %1602 = vmatprep.subr.bf16.mxu0 %v2561_v23  ;;  %v1127_v24 = vrot.slane %v1118_v21, %v3052_v9  ;;  %v1123_v26 = vrot.slane %v1118_v21, %v3057_v14 }
 0x114   : > { %1603 = vmatpush1.bf16.msra.mxu0 %v2559_v25 }
 0x115   : > { %1604 = vmatprep.subr.bf16.mxu0 %v2567_v28 }
 0x118   : > { %1605 = vmatpush1.bf16.msra.mxu0 %v2565_v29 }
 0x119   : > { %1606 = vmatprep.subr.bf16.mxu0 %v2573_v33 }
 0x11c   : > { %1607 = vmatpush1.bf16.msra.mxu0 %v2571_v32 }
 0x11d   : > { %1608 = vmatprep.subr.bf16.mxu0 %v2579_v35 }
 0x120   : > { %1609 = vmatpush1.bf16.msra.mxu0 %v2577_v37 }
 0x121   : > { %1610 = vmatprep.subr.bf16.mxu0 %v2585_v39 }
 0x124   : > { %1611 = vmatpush1.bf16.msra.mxu0 %v2583_v41 }
 0x125   : > { %1612 = vmatprep.subr.bf16.mxu0 %v2591_v43 }
 0x128   : > { %1613 = vmatpush1.bf16.msra.mxu0 %v2589_v45 }
 0x17e   : > { %v559_v47 = vpop.f32.mrb[0].mxu0 }
 0x17f   : > { %568 = vst [vmem:[#allocation2] sm:$0xff] %v559_v47  ;;  %v561_v48 = vpop.f32.mrb[1].mxu0  ;;  %v2600_v47 = vld [vmem:[#allocation9 + $0x224] ss:$8 sps:$4 sm:$0xff]  }
 0x180   : > { %569 = vst [vmem:[#allocation2 + $0x8] sm:$0xff] %v561_v48  ;;  %v563_v49 = vpop.f32.mrb[2].mxu0  ;;  %v802_v51 = vpop.f32.mrb[0].mxu1 }
 0x181   : > { %v565_v50 = vpop.f32.mrb[3].mxu0  ;;  %v816_v52 = vrot.slane %v802_v51, 7  ;;  %v804_v53 = vpop.f32.mrb[1].mxu1  ;;  %v2601_v51 = vld [vmem:[#allocation9 + $0x230] ss:$8 sps:$4 sm:$0xff]  }
 0x182   : > { %v817_v54 = vrot.slane %v804_v53, 7  ;;  %v806_v55 = vpop.f32.mrb[2].mxu1  ;;  %v2604_v53 = vld [vmem:[#allocation9 + $0x240] ss:$8 sps:$4 sm:$0xff]  }
 0x183   : > { %v818_v56 = vrot.slane %v806_v55, 7  ;;  %v808_v57 = vpop.f32.mrb[3].mxu1  ;;  %v2607_v55 = vld [vmem:[#allocation9 + $0x250] ss:$8 sps:$4 sm:$0xff]  }
 0x184   : > { %v820_v58 = vrot.slane %v808_v57, 7  ;;  %v2610_v57 = vld [vmem:[#allocation9 + $0x260] ss:$8 sps:$4 sm:$0xff]  }
 0x185   : > { %v819_v60 = vsel %vm815_vm0, %v816_v52, %v818_v56  ;;  %v2612_v56 = vld [vmem:[#allocation9 + $0x264] ss:$8 sps:$4 sm:$0xff]  }
 0x186   : > { %v572_v59 = vld [vmem:[#allocation2] sm:$0xfe]  ;;  %v828_v63 = vadd.f32 %v819_v60, %v563_v49  ;;  %v821_v0 = vsel %vm815_vm0, %v817_v54, %v820_v58  ;;  %v2615_v58 = vld [vmem:[#allocation9 + $0x274] ss:$8 sps:$4 sm:$0xff]  }
 0x187   : > { %v826_v61 = vadd.f32 %v816_v52, %v572_v59  ;;  %v573_v62 = vld [vmem:[#allocation2 + $0x8] sm:$0xfe]  ;;  %v829_v2 = vadd.f32 %v821_v0, %v565_v50  ;;  %v2603_v50 = vld [vmem:[#allocation9 + $0x234] ss:$8 sps:$4 sm:$0xff]   ;;  %v2613_v59 = vld [vmem:[#allocation9 + $0x270] ss:$8 sps:$4 sm:$0xff]  }
 0x188   : > { %v827_v1 = vadd.f32 %v817_v54, %v573_v62  ;;  %832 = vst [vmem:[#allocation2 + $0x10] sm:$0xff] %v828_v63  ;;  %v2598_v49 = vld [vmem:[#allocation9 + $0x220] ss:$8 sps:$4 sm:$0xff]   ;;  %v2606_v52 = vld [vmem:[#allocation9 + $0x244] ss:$8 sps:$4 sm:$0xff]  }
 0x189   : > { %830 = vst [vmem:[#allocation2] sm:$0xfe] %v826_v61  ;;  %833 = vst [vmem:[#allocation2 + $0x18] sm:$0xff] %v829_v2  ;;  %v2609_v54 = vld [vmem:[#allocation9 + $0x254] ss:$8 sps:$4 sm:$0xff]  }
 0x18a   : > { %831 = vst [vmem:[#allocation2 + $0x8] sm:$0xfe] %v827_v1  ;;  %v2618_v60 = vld [vmem:[#allocation9 + $0x284] ss:$8 sps:$4 sm:$0xff]   ;;  %v2616_v61 = vld [vmem:[#allocation9 + $0x280] ss:$8 sps:$4 sm:$0xff]  }
 0x18b   : > { %v2621_v62 = vld [vmem:[#allocation9 + $0x294] ss:$8 sps:$4 sm:$0xff]   ;;  %v2619_v63 = vld [vmem:[#allocation9 + $0x290] ss:$8 sps:$4 sm:$0xff]   ;;  %v2624_v0 = vld [vmem:[#allocation9 + $0x2a4] ss:$8 sps:$4 sm:$0xff]  }
 0x18c   : > { %v2622_v1 = vld [vmem:[#allocation9 + $0x2a0] ss:$8 sps:$4 sm:$0xff]   ;;  %v2627_v2 = vld [vmem:[#allocation9 + $0x2b4] ss:$8 sps:$4 sm:$0xff]  }
 0x18f   : > { %v836_v7 = vld [vmem:[#allocation2 + $0x10] sm:$0x7f] }
 0x190   : > { %v837_v11 = vld [vmem:[#allocation2 + $0x18] sm:$0x7f]  ;;  %v834_v17 = vld [vmem:[#allocation2] sm:$0xff] }
 0x191   : > { %v835_v16 = vld [vmem:[#allocation2 + $0x8] sm:$0xff] }
 0x1be   : > { %v1081_v5 = vpop.f32.mrb[4].mxu0 }
 0x1bf   : > { %v1083_v6 = vpop.f32.mrb[5].mxu0  ;;  %v1090_v20 = vadd.f32 %v1081_v5, %v834_v17  ;;  %v2628_v5 = vld [vmem:[#allocation9 + $0x2c0] ss:$8 sps:$4 sm:$0xff]  }
 0x1c0   : > { %v1085_v8 = vpop.f32.mrb[6].mxu0  ;;  %v1091_v18 = vadd.f32 %v1083_v6, %v835_v16  ;;  %v2633_v6 = vld [vmem:[#allocation9 + $0x2d4] ss:$8 sps:$4 sm:$0xff]  }
 0x1c1   : > { %v1092_v10 = vadd.f32 %v1085_v8, %v836_v7  ;;  %v1087_v12 = vpop.f32.mrb[7].mxu0  ;;  %v1114_v25 = vmul.f32 %v1107_v22, %v1090_v20  ;;  %v2631_v7 = vld [vmem:[#allocation9 + $0x2d0] ss:$8 sps:$4 sm:$0xff]   ;;  %v2636_v8 = vld [vmem:[#allocation9 + $0x2e4] ss:$8 sps:$4 sm:$0xff]  }
 0x1c2   : > { %v1093_v15 = vadd.f32 %v1087_v12, %v837_v11  ;;  %v1115_v23 = vmul.f32 %v1111_v19, %v1091_v18  ;;  %v2639_v11 = vld [vmem:[#allocation9 + $0x2f4] ss:$8 sps:$4 sm:$0xff]  }
 0x1c3   : > { %1096 = vst [vmem:[#allocation2 + $0x10] sm:$0x7f] %v1092_v10  ;;  %v1130_v32 = vadd.f32 %v1123_v26, %v1114_v25  ;;  %v2634_v10 = vld [vmem:[#allocation9 + $0x2e0] ss:$8 sps:$4 sm:$0xff]  }
 0x1c4   : > { %1097 = vst [vmem:[#allocation2 + $0x18] sm:$0x7f] %v1093_v15  ;;  %v1131_v31 = vadd.f32 %v1127_v24, %v1115_v23 }
 0x1c5   : > { %v1134_v38 = vmax.f32 %v1130_v32, 0.0 }
 0x1c6   : > { %v1135_v36 = vmax.f32 %v1131_v31, 0.0 }
 0x1ca   : > { %v1100_v27 = vld [vmem:[#allocation2 + $0x10] sm:$0xff] }
 0x1cb   : > { %v1101_v28 = vld [vmem:[#allocation2 + $0x18] sm:$0xff]  ;;  %v1116_v29 = vmul.f32 %v1107_v22, %v1100_v27 }
 0x1cc   : > { %v1117_v30 = vmul.f32 %v1111_v19, %v1101_v28 }
 0x1cd   : > { %v1132_v33 = vadd.f32 %v1123_v26, %v1116_v29 }
 0x1ce   : > { %v1133_v34 = vadd.f32 %v1127_v24, %v1117_v30 }
 0x1cf   : > { %v1136_v35 = vmax.f32 %v1132_v33, 0.0 }
 0x1d0   : > { %v1137_v37 = vmax.f32 %v1133_v34, 0.0 }
 0x1d1   : > { %v3066_v41 = vpack.c.bf16 %v1136_v35, %v1134_v38  ;;  %v1917_v38 = vld [vmem:[%s3145_s5] sm:$0x3] }
 0x1d2   : > { %v1139_v39 = vpack.c.bf16 %v1137_v37, %v1135_v36 }
 0x1d3   : > { %v1689_v12 = vshll.u32 %v3066_v41, 16  ;;  %v1687_v16 = vshrl.u32 %v3066_v41, 16 }
 0x1d4   : > { %1369 = vmatprep.mubr.bf16.mxu1 %v1139_v39  ;;  %1614 = vmatprep.mubr.bf16.mxu0 %v1139_v39  ;;  %v1696_v43 = vshll.u32 %v1139_v39, 16  ;;  %v1694_v45 = vshrl.u32 %v1139_v39, 16  ;;  %v1933_v39 = vld [vmem:[%s3146_s6] sm:$0x3] }
 0x1d5   : > { %1370 = vmatmul.mubr.bf16.vlgmr.msra.gmra.mrb[4].mxu1 %v3066_v41  ;;  %1615 = vmatmul.mubr.bf16.vlgmr.msra.gmra.mrb[8].mxu0 %v3066_v41  ;;  %v1691_v15 = vrot.slane %v1689_v12, 1  ;;  %v1926_v41 = vrot.slane %v1917_v38, %v3052_v9 }
 0x1d6   : > { %1863 = vmatpush1.bf16.msra.mxu1 %v2592_v40  ;;  %v1698_v46 = vrot.slane %v1696_v43, 1  ;;  %v1922_v40 = vrot.slane %v1917_v38, %v3057_v14 }
 0x1d7   : > { %1864 = vmatprep.subr.bf16.mxu1 %v2597_v42  ;;  %v1692_v17 = vor.u32 %v1691_v15, %v1687_v16 }
 0x1d8   : > { %v1699_v48 = vor.u32 %v1698_v46, %v1694_v45 }
 0x1da   : > { %1865 = vmatpush1.bf16.msra.mxu1 %v2595_v44  ;;  %1894 = vmatprep.mubr.bf16.mxu1 %v1699_v48  ;;  %v1938_v44 = vrot.slane %v1933_v39, %v3057_v14  ;;  %v1942_v48 = vrot.slane %v1933_v39, %v3052_v9  ;;  %v2640_v9 = vld [vmem:[%s3030_s21] sm:$0xff] }
 0x1db   : > { %1866 = vmatprep.subr.bf16.mxu1 %v2600_v47 }
 0x1de   : > { %1867 = vmatpush1.bf16.msra.mxu1 %v2598_v49 }
 0x1df   : > { %1868 = vmatprep.subr.bf16.mxu1 %v2603_v50 }
 0x1e2   : > { %1869 = vmatpush1.bf16.msra.mxu1 %v2601_v51 }
 0x1e3   : > { %1870 = vmatprep.subr.bf16.mxu1 %v2606_v52 }
 0x1e6   : > { %1871 = vmatpush1.bf16.msra.mxu1 %v2604_v53 }
 0x1e7   : > { %1872 = vmatprep.subr.bf16.mxu1 %v2609_v54 }
 0x1ea   : > { %1873 = vmatpush1.bf16.msra.mxu1 %v2607_v55 }
 0x1eb   : > { %1874 = vmatprep.subr.bf16.mxu1 %v2612_v56 }
 0x1ee   : > { %1875 = vmatpush1.bf16.msra.mxu1 %v2610_v57 }
 0x1ef   : > { %1876 = vmatprep.subr.bf16.mxu1 %v2615_v58 }
 0x1f2   : > { %1877 = vmatpush1.bf16.msra.mxu1 %v2613_v59 }
 0x1f3   : > { %1878 = vmatprep.subr.bf16.mxu1 %v2618_v60  ;;  %v2641_v60 = vld [vmem:[%s3030_s21 + $0x8] sm:$0xff] }
 0x1f6   : > { %1879 = vmatpush1.bf16.msra.mxu1 %v2616_v61 }
 0x1f7   : > { %1880 = vmatprep.subr.bf16.mxu1 %v2621_v62 }
 0x1fa   : > { %1881 = vmatpush1.bf16.msra.mxu1 %v2619_v63 }
 0x1fb   : > { %1882 = vmatprep.subr.bf16.mxu1 %v2624_v0 }
 0x1fe   : > { %1883 = vmatpush1.bf16.msra.mxu1 %v2622_v1 }
 0x1ff   : > { %1884 = vmatprep.subr.bf16.mxu1 %v2627_v2 }
 0x202   : > { %1885 = vmatpush1.bf16.msra.mxu1 %v2625_v3 }
 0x203   : > { %1886 = vmatprep.subr.bf16.mxu1 %v2630_v4 }
 0x206   : > { %1887 = vmatpush1.bf16.msra.mxu1 %v2628_v5 }
 0x207   : > { %1888 = vmatprep.subr.bf16.mxu1 %v2633_v6  ;;  %v2642_v6 = vld [vmem:[%s3030_s21 + $0x10] sm:$0xff] }
 0x20a   : > { %1889 = vmatpush1.bf16.msra.mxu1 %v2631_v7 }
 0x20b   : > { %1890 = vmatprep.subr.bf16.mxu1 %v2636_v8  ;;  %v2643_v8 = vld [vmem:[%s3030_s21 + $0x18] sm:$0xff]  ;;  %s2809_s21 = smov [#allocation10]  }
 0x20c   : > { %s2734_s11 = sshll.u32 %s2809_s21, 4  ;;  %s2735_s11 = int_to_ptr.vmem [resolvable:$false] %s2734_s11 }
 0x20d   : > { %s2736_s22 = scalar_lea.vmem %s2735_s11, 1024  ;;  %p2737_p7 = scmp.lt.s32.totalorder %s3096_s18, %s2735_s11 }
 0x20e   : > { %1891 = vmatpush1.bf16.msra.mxu1 %v2634_v10  ;;  %p2738_p9 = scmp.lt.s32.totalorder %s2736_s22, %s2730_s20 }
 0x20f   : > { %1892 = vmatprep.subr.bf16.mxu1 %v2639_v11 }
 0x210   : > { %p2739_p12 = por %p2738_p9, %p2737_p7 }
 0x212   : > { %1893 = vmatpush1.bf16.msra.mxu1 %v2637_v13  ;;  %p2740_p2 = pnand %p2739_p12, %p2733_p3 }
 0x215   : > { %1895 = vmatmul.mubr.bf16.vlgmr.msra.gmra.mrb[8].mxu1 %v1692_v17 }
 0x2a8   : > { %v1371_v18 = vpop.f32.mrb[4].mxu1  ;;  %v1616_v19 = vpop.f32.mrb[8].mxu0 }
 0x2a9   : > { %1380 = vst [vmem:[#allocation2] sm:$0xff] %v1371_v18  ;;  %v1373_v20 = vpop.f32.mrb[5].mxu1  ;;  %v1618_v21 = vpop.f32.mrb[9].mxu0  ;;  %v1629_v24 = vrot.slane %v1616_v19, 7 }
 0x2aa   : > { %1381 = vst [vmem:[#allocation2 + $0x8] sm:$0xff] %v1373_v20  ;;  %v1375_v22 = vpop.f32.mrb[6].mxu1  ;;  %v1620_v23 = vpop.f32.mrb[10].mxu0  ;;  %v1630_v28 = vrot.slane %v1618_v21, 7 }
 0x2ab   : > { %v1631_v25 = vrot.slane %v1620_v23, 7  ;;  %v1377_v26 = vpop.f32.mrb[7].mxu1  ;;  %v1622_v27 = vpop.f32.mrb[11].mxu0 }
 0x2ac   : > { %v1633_v29 = vrot.slane %v1622_v27, 7 }
 0x2ad   : > { %v1632_v30 = vsel %vm815_vm0, %v1629_v24, %v1631_v25 }
 0x2ae   : > { %v1641_v31 = vadd.f32 %v1632_v30, %v1375_v22  ;;  %v1634_v32 = vsel %vm815_vm0, %v1630_v28, %v1633_v29 }
 0x2af   : > { %v1642_v33 = vadd.f32 %v1634_v32, %v1377_v26 }
 0x2b0   : > { %v1384_v34 = vld [vmem:[#allocation2] sm:$0xfe]  ;;  %1645 = vst [vmem:[#allocation2 + $0x10] sm:$0xff] %v1641_v31 }
 0x2b1   : > { %v1639_v35 = vadd.f32 %v1629_v24, %v1384_v34  ;;  %v1385_v36 = vld [vmem:[#allocation2 + $0x8] sm:$0xfe]  ;;  %1646 = vst [vmem:[#allocation2 + $0x18] sm:$0xff] %v1642_v33 }
 0x2b2   : > { %v1640_v37 = vadd.f32 %v1630_v28, %v1385_v36 }
 0x2b3   : > { %1643 = vst [vmem:[#allocation2] sm:$0xfe] %v1639_v35 }
 0x2b4   : > { %1644 = vst [vmem:[#allocation2 + $0x8] sm:$0xfe] %v1640_v37 }
 0x2b7   : > { %v1649_v50 = vld [vmem:[#allocation2 + $0x10] sm:$0x7f] }
 0x2b8   : > { %v1650_v53 = vld [vmem:[#allocation2 + $0x18] sm:$0x7f] }
 0x2ba   : > { %v1647_v42 = vld [vmem:[#allocation2] sm:$0xff] }
 0x2bb   : > { %v1648_v46 = vld [vmem:[#allocation2 + $0x8] sm:$0xff] }
 0x2e8   : > { %v1896_v43 = vpop.f32.mrb[8].mxu1 }
 0x2e9   : > { %v1905_v45 = vadd.f32 %v1896_v43, %v1647_v42  ;;  %v1898_v47 = vpop.f32.mrb[9].mxu1 }
 0x2ea   : > { %v1906_v49 = vadd.f32 %v1898_v47, %v1648_v46  ;;  %v1900_v51 = vpop.f32.mrb[10].mxu1 }
 0x2eb   : > { %1909 = vst [vmem:[#allocation2] sm:$0xff] %v1905_v45  ;;  %v1907_v52 = vadd.f32 %v1900_v51, %v1649_v50  ;;  %v1902_v54 = vpop.f32.mrb[11].mxu1  ;;  %v1929_v55 = vmul.f32 %v1922_v40, %v1905_v45 }
 0x2ec   : > { %1910 = vst [vmem:[#allocation2 + $0x8] sm:$0xff] %v1906_v49  ;;  %v1908_v56 = vadd.f32 %v1902_v54, %v1650_v53  ;;  %v1930_v57 = vmul.f32 %v1926_v41, %v1906_v49 }
 0x2ed   : > { %1911 = vst [vmem:[#allocation2 + $0x10] sm:$0x7f] %v1907_v52  ;;  %v1945_v14 = vadd.f32 %v1938_v44, %v1929_v55 }
 0x2ee   : > { %1912 = vst [vmem:[#allocation2 + $0x18] sm:$0x7f] %v1908_v56  ;;  %v1946_v58 = vadd.f32 %v1942_v48, %v1930_v57 }
 0x2ef   : > { %v1949_v59 = vadd.f32 %v2640_v9, %v1945_v14 }
 0x2f0   : > { %v1950_v61 = vadd.f32 %v2641_v60, %v1946_v58 }
 0x2f1   : > { %v1953_v62 = vmax.f32 %v1949_v59, 0.0 }
 0x2f2   : > { %v1954_v63 = vmax.f32 %v1950_v61, 0.0 }
 0x2f3   : > { %1957 = vst [vmem:[%s325_s12] sm:$0xff] %v1953_v62 }
 0x2f4   : > { %v1915_v0 = vld [vmem:[#allocation2 + $0x10] sm:$0xff]  ;;  %1958 = vst [vmem:[%s325_s12 + $0x8] sm:$0xff] %v1954_v63 }
 0x2f5   : > { %v1916_v1 = vld [vmem:[#allocation2 + $0x18] sm:$0xff]  ;;  %v1931_v2 = vmul.f32 %v1922_v40, %v1915_v0 }
 0x2f6   : > { %v1932_v3 = vmul.f32 %v1926_v41, %v1916_v1 }
 0x2f7   : > { %v1947_v4 = vadd.f32 %v1938_v44, %v1931_v2 }
 0x2f8   : > { %v1948_v5 = vadd.f32 %v1942_v48, %v1932_v3 }
 0x2f9   : > { %v1951_v7 = vadd.f32 %v2642_v6, %v1947_v4 }
 0x2fa   : > { %v1952_v10 = vadd.f32 %v2643_v8, %v1948_v5 }
 0x2fb   : > { %v1955_v11 = vmax.f32 %v1951_v7, 0.0 }
 0x2fc   : > { %v1956_v12 = vmax.f32 %v1952_v10, 0.0 }
 0x2fd   : > { %1959 = vst [vmem:[%s325_s12 + $0x10] sm:$0xff] %v1955_v11 }
 0x2fe   : > { %1960 = vst [vmem:[%s325_s12 + $0x18] sm:$0xff] %v1956_v12 }
 0x2ff   : > { %2743 = shalt.err (!%p2740_p2)
}
 0x300   : > { %s2744_s10 = scalar_lea.hbm %s3094_s29, 512  ;;  %s2748_s12 = scalar_lea.hbm %s3147_s7, 1024 }
 0x301   : > { %p2745_p13 = scmp.ne.s32.totalorder %s3094_s29, %s2744_s10  ;;  %p2749_p4 = scmp.lt.u32.totalorder %s3094_s29, %s3147_s7 }
 0x302   : > { %p2750_p5 = scmp.lt.u32.totalorder %s2748_s12, %s2744_s10  ;;  %p2752_p11 = scmp.lt.u32.totalorder %s2744_s10, %s3094_s29 }
 0x303   : > { %p2746_p6 = pnand %p2745_p13, %p3161_p0 }
 0x304   : > { %p2751_p8 = por %p2750_p5, %p2749_p4 }
 0x305   : > { %p2747_p10 = pneg %p2746_p6 }
 0x306   : > { %p2753_p1 = por %p2752_p11, %p2751_p8 }
 0x308   : > { %p2754_p3 = pnand %p2753_p1, %p2747_p10 }
 0x30a   : > { %2757 = shalt.err (!%p2754_p3)
}
 0x30b   : > { %s2810_s9 = smov 256   ;;  %s2811_s20 = smov 16  }
 0x30c   : > { %2289 = dma.vmem_to_hbm [thread:$0]  (%p3161_p0), %s3096_s18, 512, %s3094_s29, %s1962_s28, %s2810_s9, %s2810_s9, %s2811_s20  }
 0x30d PF: > { %s1990_s21 = sand.u32 1, %s2788_s24   ;;  %p3162_p7 = scmp.ne.s32.totalorder %s3152_s8, 0 }
 0x30e   : > { %p3163_p9 = scmp.ge.s32.totalorder %s2800_s27, 2  ;;  %s1991_s11 = scalar_lea.sflag [#allocation6], %s1990_s21 }
 0x310   : > { %p2303_p12 = pnand %p3163_p9, %p3162_p7 }
 0x312   : > { %2783 = dma.done.wait (!%p2303_p12), %s1991_s11, 512  }
 0x313   : > { %2785 = vsyncadd (!%p2303_p12), %s1991_s11, 4294966784  ;;  %p21_p2 = scmp.ge.s32.totalorder %s2962_s13, 4   ;;  %s3164_s24 = smov %s2792_s25 }
 0x314   : > { %s3165_s25 = smov %s2796_s26  ;;  %s3166_s26 = smov %s2978_s17 }
 0x315   : > { %s3167_s27 = smov %s2962_s13  ;;  %23 = sbr.rel (!%p21_p2) target bundleno = 6 (0x6), region = 105 }
 0x31c   :  { %1996 = vsyncpa [#allocation5], 1 }
 0x31d   :  { %1998 = vsyncpa [#allocation5 + $0x1], 1 }
 0x31e   :  { %1999 = vsyncpa [#allocation8], 1 }
 0x31f   :  { %2000 = vsyncpa [#allocation6], 1 }
 0x320   :  { %2002 = vsyncpa [#allocation6 + $0x1], 1 }

</bundles_post_ra>
